<compile_context>
chip_gen: v7x
topology: tpu7x:2x2x1
jax: 0.10.0
libtpu: 0.0.40
codegen_flags: <defaults>
</compile_context>

<pallas_src>
import functools

import jax
import jax.numpy as jnp
import numpy as np
from jax.experimental import pallas as pl
from jax.experimental.pallas import tpu as pltpu


# ----------------------------- config (small, synthetic) -----------------------------
BATCH = 2
SEQ = 8
HIDDEN = 32
N_HEADS = 4
HEAD_DIM = HIDDEN // N_HEADS          # 8
INTERMEDIATE = 64
RMS_EPS = 1e-6
ATTENTION_MULTIPLIER = 0.0883883476   # Granite: custom qk scale (not 1/sqrt(head_dim))
RESIDUAL_MULTIPLIER = 0.22            # Granite: custom residual scale
ROPE_THETA = 10000.0


# ----------------------------- kernel helpers -----------------------------
def _rmsnorm(x, w, eps):
    var = jnp.mean(x * x, axis=-1, keepdims=True)
    return x * jax.lax.rsqrt(var + eps) * w


# ----------------------------- fused decoder-layer kernel -----------------------------
def granite_decoder_kernel(
    x_ref, mask_ref, cos_ref, sin_ref,
    wqkv_ref, wo_ref, ln_in_ref, ln_post_ref, wgu_ref, wd_ref,
    out_ref, k_out_ref, v_out_ref,
    *, seq, hidden, n_heads, head_dim, intermediate,
    eps, qk_scale, residual_multiplier,
):
    x = x_ref[0]                    # (S, H) f32 residual stream for this batch element
    mask = mask_ref[...]            # (S, S) additive causal mask
    cos = cos_ref[...][None]        # (1, S, D) -- broadcast across heads in-kernel
    sin = sin_ref[...][None]

    # ---- input RMSNorm (f32) ----
    h = _rmsnorm(x, ln_in_ref[...], eps)

    # ---- fused QKV projection: one bf16 MXU push, f32 accumulation ----
    qkv = jnp.dot(h.astype(jnp.bfloat16), wqkv_ref[...],
                  preferred_element_type=jnp.float32)          # (S, 3H)
    q = qkv[:, :hidden]
    k = qkv[:, hidden:2 * hidden]
    v = qkv[:, 2 * hidden:]

    # ---- head-separated views (n_heads, S, D): heads become a batch dim ----
    def to_heads(t):
        return jnp.transpose(t.reshape(seq, n_heads, head_dim), (1, 0, 2))

    qh = to_heads(q)
    kh = to_heads(k)
    vh = to_heads(v).astype(jnp.bfloat16)

    # ---- RoPE: rotate_half is a half-swap along head_dim (no MXU permutation matmul) ----
    half = head_dim // 2

    def rope(t):
        rot = jnp.concatenate([-t[..., half:], t[..., :half]], axis=-1)
        return t * cos + rot * sin

    qh = rope(qh).astype(jnp.bfloat16)
    kh = rope(kh).astype(jnp.bfloat16)

    # ---- KV cache written directly in consumer layout (n_heads, S, D), bf16 ----
    k_out_ref[0] = kh
    v_out_ref[0] = vh

    # ---- attention: one head-batched einsum pair, bf16 MXU / f32 softmax ----
    s = jnp.einsum("hqd,hkd->hqk", qh, kh,
                   preferred_element_type=jnp.float32)          # (nh, S, S)
    s = s * qk_scale + mask[None]
    s = s - jnp.max(s, axis=-1, keepdims=True)
    p = jnp.exp(s)
    p = p * pl.reciprocal(jnp.sum(p, axis=-1, keepdims=True), approx=True)
    o = jnp.einsum("hqk,hkd->hqd", p.astype(jnp.bfloat16), vh,
                   preferred_element_type=jnp.float32)          # (nh, S, D)
    o = jnp.transpose(o, (1, 0, 2)).reshape(seq, hidden)        # (S, H)

    attn = jnp.dot(o.astype(jnp.bfloat16), wo_ref[...],
                   preferred_element_type=jnp.float32)

    # ---- residual add with Granite residual multiplier ----
    hidden_res = x + attn * residual_multiplier

    # ---- post-attention RMSNorm + SwiGLU MLP (fused gate/up) ----
    h2 = _rmsnorm(hidden_res, ln_post_ref[...], eps)
    gu = jnp.dot(h2.astype(jnp.bfloat16), wgu_ref[...],
                 preferred_element_type=jnp.float32)            # (S, 2I)
    g = gu[:, :intermediate]
    u = gu[:, intermediate:]
    g = g * jax.nn.sigmoid(g)                                   # SiLU
    mlp = jnp.dot((g * u).astype(jnp.bfloat16), wd_ref[...],
                  preferred_element_type=jnp.float32)           # (S, H)

    out_ref[0] = hidden_res + mlp * residual_multiplier


# ----------------------------- one-time weight preparation (outside jit) -----------------------------
def prepare_weights(params):
    H = HIDDEN
    return {
        "wqkv": jnp.concatenate([params["wq"], params["wk"], params["wv"]],
                                axis=1).astype(jnp.bfloat16),
        "wgu": jnp.concatenate([params["wg"], params["wu"]],
                               axis=1).astype(jnp.bfloat16),
        "wo": params["wo"].astype(jnp.bfloat16),
        "wd": params["wd"].astype(jnp.bfloat16),
        "ln_in": params["ln_in"].reshape(1, H),
        "ln_post": params["ln_post"].reshape(1, H),
    }


# ----------------------------- wrapper -----------------------------
def granite_decoder_layer(x, attn_mask, cos, sin, w):
    B, S, H = x.shape
    D = HEAD_DIM
    I = INTERMEDIATE

    kernel = functools.partial(
        granite_decoder_kernel,
        seq=S, hidden=H, n_heads=N_HEADS, head_dim=D, intermediate=I,
        eps=RMS_EPS, qk_scale=ATTENTION_MULTIPLIER,
        residual_multiplier=RESIDUAL_MULTIPLIER,
    )

    const = lambda b: (0, 0)   # weights / tables: resident block, no re-DMA across grid steps
    grid_spec = pltpu.PrefetchScalarGridSpec(
        num_scalar_prefetch=0,
        grid=(B,),
        in_specs=[
            pl.BlockSpec((1, S, H), lambda b: (b, 0, 0)),     # x: pipelined per batch element
            pl.BlockSpec((S, S), const),                      # causal mask (resident)
            pl.BlockSpec((S, D), const),                      # cos, compact (resident)
            pl.BlockSpec((S, D), const),                      # sin, compact (resident)
            pl.BlockSpec((H, 3 * H), const),                  # fused QKV weight (resident)
            pl.BlockSpec((H, H), const),                      # wo (resident)
            pl.BlockSpec((1, H), const),                      # ln_in
            pl.BlockSpec((1, H), const),                      # ln_post
            pl.BlockSpec((H, 2 * I), const),                  # fused gate/up weight (resident)
            pl.BlockSpec((I, H), const),                      # wd (resident)
        ],
        out_specs=(
            pl.BlockSpec((1, S, H), lambda b: (b, 0, 0)),             # hidden states
            pl.BlockSpec((1, N_HEADS, S, D), lambda b: (b, 0, 0, 0)),  # K cache (bf16)
            pl.BlockSpec((1, N_HEADS, S, D), lambda b: (b, 0, 0, 0)),  # V cache (bf16)
        ),
    )
    out_shape = (
        jax.ShapeDtypeStruct((B, S, H), jnp.float32),
        jax.ShapeDtypeStruct((B, N_HEADS, S, D), jnp.bfloat16),
        jax.ShapeDtypeStruct((B, N_HEADS, S, D), jnp.bfloat16),
    )

    hidden, k_cache, v_cache = pl.pallas_call(
        kernel,
        out_shape=out_shape,
        grid_spec=grid_spec,
        compiler_params=pltpu.CompilerParams(
            dimension_semantics=("parallel",),   # batch is independent -> megacore on v7x
        ),
    )(x, attn_mask, cos, sin,
      w["wqkv"], w["wo"], w["ln_in"], w["ln_post"], w["wgu"], w["wd"])

    # module returns (hidden_states, present_key_value, cos_cache, sin_cache)
    return hidden, (k_cache, v_cache), cos, sin


# ----------------------------- pure-JAX reference (for self-check) -----------------------------
def reference_layer(x, attn_mask, cos, sin, p):
    def rms(h, w):
        var = jnp.mean(h * h, axis=-1, keepdims=True)
        return h * jax.lax.rsqrt(var + RMS_EPS) * w

    def rot(t):
        d = t.shape[-1]
        return jnp.concatenate([-t[..., d // 2:], t[..., : d // 2]], axis=-1)

    B, S, H = x.shape
    h = rms(x, p["ln_in"])
    q = h @ p["wq"]
    k = h @ p["wk"]
    v = h @ p["wv"]
    q = q.reshape(B, S, N_HEADS, HEAD_DIM).transpose(0, 2, 1, 3)
    k = k.reshape(B, S, N_HEADS, HEAD_DIM).transpose(0, 2, 1, 3)
    v = v.reshape(B, S, N_HEADS, HEAD_DIM).transpose(0, 2, 1, 3)
    q = q * cos + rot(q) * sin
    k = k * cos + rot(k) * sin
    scores = jnp.einsum("bhqd,bhkd->bhqk", q, k) * ATTENTION_MULTIPLIER + attn_mask
    pmat = jax.nn.softmax(scores, axis=-1)
    o = jnp.einsum("bhqk,bhkd->bhqd", pmat, v)
    o = o.transpose(0, 2, 1, 3).reshape(B, S, H) @ p["wo"]
    hidden = x + o * RESIDUAL_MULTIPLIER
    h2 = rms(hidden, p["ln_post"])
    g = h2 @ p["wg"]
    g = g * jax.nn.sigmoid(g)
    mlp = (g * (h2 @ p["wu"])) @ p["wd"]
    return hidden + mlp * RESIDUAL_MULTIPLIER, k, v


# ----------------------------- setup & run -----------------------------
def make_rope(seq_len, dim, theta):
    inv_freq = 1.0 / (theta ** (jnp.arange(0, dim, 2, dtype=jnp.float32) / dim))
    pos = jnp.arange(seq_len, dtype=jnp.float32)
    ang = pos[:, None] * inv_freq[None, :]            # (S, D/2)
    emb = jnp.concatenate([ang, ang], axis=-1)        # (S, D)
    return jnp.cos(emb), jnp.sin(emb)


if __name__ == "__main__":
    key = jax.random.PRNGKey(0)
    ks = jax.random.split(key, 12)
    scale = 0.05
    params = {
        "wq": jax.random.normal(ks[0], (HIDDEN, HIDDEN), jnp.float32) * scale,
        "wk": jax.random.normal(ks[1], (HIDDEN, HIDDEN), jnp.float32) * scale,
        "wv": jax.random.normal(ks[2], (HIDDEN, HIDDEN), jnp.float32) * scale,
        "wo": jax.random.normal(ks[3], (HIDDEN, HIDDEN), jnp.float32) * scale,
        "ln_in": 1.0 + 0.1 * jax.random.normal(ks[4], (HIDDEN,), jnp.float32),
        "ln_post": 1.0 + 0.1 * jax.random.normal(ks[5], (HIDDEN,), jnp.float32),
        "wg": jax.random.normal(ks[6], (HIDDEN, INTERMEDIATE), jnp.float32) * scale,
        "wu": jax.random.normal(ks[7], (HIDDEN, INTERMEDIATE), jnp.float32) * scale,
        "wd": jax.random.normal(ks[8], (INTERMEDIATE, HIDDEN), jnp.float32) * scale,
    }

    x = jax.random.normal(ks[9], (BATCH, SEQ, HIDDEN), jnp.float32)
    cos, sin = make_rope(SEQ, HEAD_DIM, ROPE_THETA)
    # additive causal mask (S, S): 0 where allowed, large negative where masked
    causal = jnp.where(jnp.tril(jnp.ones((SEQ, SEQ), jnp.bool_)), 0.0, -1e9).astype(jnp.float32)

    # weights fused / cast once, outside the per-call path
    fused_w = prepare_weights(params)
    fused_w = jax.tree_util.tree_map(jax.block_until_ready, fused_w)

    layer = jax.jit(granite_decoder_layer)
    hidden, (k_cache, v_cache), cos_cache, sin_cache = layer(x, causal, cos, sin, fused_w)
    jax.block_until_ready(hidden)
    jax.block_until_ready(k_cache)
    jax.block_until_ready(v_cache)

    ref_out, ref_k, ref_v = reference_layer(x, causal, cos, sin, params)
    # bf16 matmul inputs / bf16 KV storage (f32 accumulation) -> loosened tolerance
    np.testing.assert_allclose(np.asarray(hidden), np.asarray(ref_out), rtol=2e-2, atol=2e-2)
    np.testing.assert_allclose(np.asarray(k_cache.astype(jnp.float32)),
                               np.asarray(ref_k), rtol=2e-2, atol=2e-2)
    np.testing.assert_allclose(np.asarray(v_cache.astype(jnp.float32)),
                               np.asarray(ref_v), rtol=2e-2, atol=2e-2)

    print("KERNEL_OK")
</pallas_src>

<mosaic_0001>
module attributes {stable_mosaic.version = 11 : i64} {
  func.func @granite_decoder_kernel(%arg0: i32, %arg1: memref<1x8x32xf32, #tpu.memory_space<vmem>>, %arg2: memref<8x8xf32, #tpu.memory_space<vmem>>, %arg3: memref<8x8xf32, #tpu.memory_space<vmem>>, %arg4: memref<8x8xf32, #tpu.memory_space<vmem>>, %arg5: memref<32x96xbf16, #tpu.memory_space<vmem>>, %arg6: memref<32x32xbf16, #tpu.memory_space<vmem>>, %arg7: memref<1x32xf32, #tpu.memory_space<vmem>>, %arg8: memref<1x32xf32, #tpu.memory_space<vmem>>, %arg9: memref<32x128xbf16, #tpu.memory_space<vmem>>, %arg10: memref<64x32xbf16, #tpu.memory_space<vmem>>, %arg11: memref<1x8x32xf32, #tpu.memory_space<vmem>>, %arg12: memref<1x4x8x8xbf16, #tpu.memory_space<vmem>>, %arg13: memref<1x4x8x8xbf16, #tpu.memory_space<vmem>>) attributes {dimension_semantics = [#tpu.dimension_semantics<parallel>], iteration_bounds = array<i64: 2>, scalar_prefetch = 0 : i64, scratch_operands = 0 : i64, tpu.core_type = #tpu.core_type<tc>, window_params = [{transform_indices = @transform_0, window_bounds = array<i64: 1, 8, 32>}, {pipeline_mode = #tpu.pipeline_mode<synchronous>, transform_indices = @transform_1, window_bounds = array<i64: 8, 8>}, {pipeline_mode = #tpu.pipeline_mode<synchronous>, transform_indices = @transform_2, window_bounds = array<i64: 8, 8>}, {pipeline_mode = #tpu.pipeline_mode<synchronous>, transform_indices = @transform_3, window_bounds = array<i64: 8, 8>}, {pipeline_mode = #tpu.pipeline_mode<synchronous>, transform_indices = @transform_4, window_bounds = array<i64: 32, 96>}, {pipeline_mode = #tpu.pipeline_mode<synchronous>, transform_indices = @transform_5, window_bounds = array<i64: 32, 32>}, {pipeline_mode = #tpu.pipeline_mode<synchronous>, transform_indices = @transform_6, window_bounds = array<i64: 1, 32>}, {pipeline_mode = #tpu.pipeline_mode<synchronous>, transform_indices = @transform_7, window_bounds = array<i64: 1, 32>}, {pipeline_mode = #tpu.pipeline_mode<synchronous>, transform_indices = @transform_8, window_bounds = array<i64: 32, 128>}, {pipeline_mode = #tpu.pipeline_mode<synchronous>, transform_indices = @transform_9, window_bounds = array<i64: 64, 32>}, {transform_indices = @transform_10, window_bounds = array<i64: 1, 8, 32>}, {transform_indices = @transform_11, window_bounds = array<i64: 1, 4, 8, 8>}, {transform_indices = @transform_12, window_bounds = array<i64: 1, 4, 8, 8>}]} {
    %c0 = arith.constant 0 : index
    %c0_0 = arith.constant 0 : index
    %c0_1 = arith.constant 0 : index
    %0 = vector.load %arg1[%c0, %c0_0, %c0_1] : memref<1x8x32xf32, #tpu.memory_space<vmem>>, vector<1x8x32xf32>
    %1 = vector.shape_cast %0 : vector<1x8x32xf32> to vector<8x32xf32>
    %c0_2 = arith.constant 0 : index
    %c0_3 = arith.constant 0 : index
    %2 = vector.load %arg2[%c0_2, %c0_3] : memref<8x8xf32, #tpu.memory_space<vmem>>, vector<8x8xf32>
    %c0_4 = arith.constant 0 : index
    %c0_5 = arith.constant 0 : index
    %3 = vector.load %arg3[%c0_4, %c0_5] : memref<8x8xf32, #tpu.memory_space<vmem>>, vector<8x8xf32>
    %4 = vector.shape_cast %3 : vector<8x8xf32> to vector<1x8x8xf32>
    %c0_6 = arith.constant 0 : index
    %c0_7 = arith.constant 0 : index
    %5 = vector.load %arg4[%c0_6, %c0_7] : memref<8x8xf32, #tpu.memory_space<vmem>>, vector<8x8xf32>
    %6 = vector.shape_cast %5 : vector<8x8xf32> to vector<1x8x8xf32>
    %c0_8 = arith.constant 0 : index
    %c0_9 = arith.constant 0 : index
    %7 = vector.load %arg7[%c0_8, %c0_9] : memref<1x32xf32, #tpu.memory_space<vmem>>, vector<1x32xf32>
    %8 = arith.mulf %1, %1 : vector<8x32xf32>
    %cst = arith.constant dense<0.000000e+00> : vector<8xf32>
    %9 = vector.multi_reduction <add>, %8, %cst [1] : vector<8x32xf32> to vector<8xf32>
    %10 = vector.shape_cast %9 : vector<8xf32> to vector<8x1xf32>
    %cst_10 = arith.constant 3.200000e+01 : f32
    %11 = vector.broadcast %cst_10 : f32 to vector<8x1xf32>
    %12 = arith.divf %10, %11 : vector<8x1xf32>
    %cst_11 = arith.constant 9.99999997E-7 : f32
    %13 = vector.broadcast %cst_11 : f32 to vector<8x1xf32>
    %14 = arith.addf %12, %13 : vector<8x1xf32>
    %15 = math.rsqrt %14 : vector<8x1xf32>
    %16 = vector.broadcast %15 : vector<8x1xf32> to vector<8x32xf32>
    %17 = arith.mulf %1, %16 : vector<8x32xf32>
    %18 = vector.broadcast %7 : vector<1x32xf32> to vector<8x32xf32>
    %19 = arith.mulf %17, %18 : vector<8x32xf32>
    %20 = arith.truncf %19 : vector<8x32xf32> to vector<8x32xbf16>
    %c0_12 = arith.constant 0 : index
    %c0_13 = arith.constant 0 : index
    %21 = vector.load %arg5[%c0_12, %c0_13] : memref<32x96xbf16, #tpu.memory_space<vmem>>, vector<32x96xbf16>
    %cst_14 = arith.constant dense<0.000000e+00> : vector<8x96xf32>
    %22 = tpu.matmul %20, %21, %cst_14 {dimension_numbers = #tpu.dot_dimension_numbers<[1], [0], [0], [1], [0, 0, 1, 1], [], []>} : vector<8x32xbf16>, vector<32x96xbf16>, vector<8x96xf32> -> vector<8x96xf32>
    %23 = vector.extract_strided_slice %22 {offsets = [0, 0], sizes = [8, 32], strides = [1, 1]} : vector<8x96xf32> to vector<8x32xf32>
    %24 = vector.extract_strided_slice %22 {offsets = [0, 32], sizes = [8, 32], strides = [1, 1]} : vector<8x96xf32> to vector<8x32xf32>
    %25 = vector.extract_strided_slice %22 {offsets = [0, 64], sizes = [8, 32], strides = [1, 1]} : vector<8x96xf32> to vector<8x32xf32>
    %26 = vector.shape_cast %23 : vector<8x32xf32> to vector<8x4x8xf32>
    %27 = tpu.transpose %26, [1, 0, 2] : vector<8x4x8xf32> -> vector<4x8x8xf32>
    %28 = vector.shape_cast %24 : vector<8x32xf32> to vector<8x4x8xf32>
    %29 = tpu.transpose %28, [1, 0, 2] : vector<8x4x8xf32> -> vector<4x8x8xf32>
    %30 = vector.shape_cast %25 : vector<8x32xf32> to vector<8x4x8xf32>
    %31 = tpu.transpose %30, [1, 0, 2] : vector<8x4x8xf32> -> vector<4x8x8xf32>
    %32 = arith.truncf %31 : vector<4x8x8xf32> to vector<4x8x8xbf16>
    %33 = vector.extract_strided_slice %27 {offsets = [0, 0, 4], sizes = [4, 8, 4], strides = [1, 1, 1]} : vector<4x8x8xf32> to vector<4x8x4xf32>
    %cst_15 = arith.constant 0.000000e+00 : f32
    %34 = vector.broadcast %cst_15 : f32 to vector<4x8x4xf32>
    %35 = arith.subf %34, %33 : vector<4x8x4xf32>
    %36 = vector.extract_strided_slice %27 {offsets = [0, 0, 0], sizes = [4, 8, 4], strides = [1, 1, 1]} : vector<4x8x8xf32> to vector<4x8x4xf32>
    %37 = tpu.concatenate %35, %36 in 2 : vector<4x8x4xf32>, vector<4x8x4xf32> -> vector<4x8x8xf32>
    %38 = vector.broadcast %4 : vector<1x8x8xf32> to vector<4x8x8xf32>
    %39 = arith.mulf %27, %38 : vector<4x8x8xf32>
    %40 = vector.broadcast %6 : vector<1x8x8xf32> to vector<4x8x8xf32>
    %41 = arith.mulf %37, %40 : vector<4x8x8xf32>
    %42 = arith.addf %39, %41 : vector<4x8x8xf32>
    %43 = arith.truncf %42 : vector<4x8x8xf32> to vector<4x8x8xbf16>
    %44 = vector.extract_strided_slice %29 {offsets = [0, 0, 4], sizes = [4, 8, 4], strides = [1, 1, 1]} : vector<4x8x8xf32> to vector<4x8x4xf32>
    %cst_16 = arith.constant 0.000000e+00 : f32
    %45 = vector.broadcast %cst_16 : f32 to vector<4x8x4xf32>
    %46 = arith.subf %45, %44 : vector<4x8x4xf32>
    %47 = vector.extract_strided_slice %29 {offsets = [0, 0, 0], sizes = [4, 8, 4], strides = [1, 1, 1]} : vector<4x8x8xf32> to vector<4x8x4xf32>
    %48 = tpu.concatenate %46, %47 in 2 : vector<4x8x4xf32>, vector<4x8x4xf32> -> vector<4x8x8xf32>
    %49 = vector.broadcast %4 : vector<1x8x8xf32> to vector<4x8x8xf32>
    %50 = arith.mulf %29, %49 : vector<4x8x8xf32>
    %51 = vector.broadcast %6 : vector<1x8x8xf32> to vector<4x8x8xf32>
    %52 = arith.mulf %48, %51 : vector<4x8x8xf32>
    %53 = arith.addf %50, %52 : vector<4x8x8xf32>
    %54 = arith.truncf %53 : vector<4x8x8xf32> to vector<4x8x8xbf16>
    %c0_17 = arith.constant 0 : index
    %c0_18 = arith.constant 0 : index
    %c0_19 = arith.constant 0 : index
    %c0_20 = arith.constant 0 : index
    %55 = vector.load %arg12[%c0_17, %c0_18, %c0_19, %c0_20] : memref<1x4x8x8xbf16, #tpu.memory_space<vmem>>, vector<1x4x8x8xbf16>
    %56 = vector.shape_cast %55 : vector<1x4x8x8xbf16> to vector<4x8x8xbf16>
    %57 = vector.shape_cast %54 : vector<4x8x8xbf16> to vector<1x4x8x8xbf16>
    tpu.vector_store %arg12[%c0_17, %c0_18, %c0_19, %c0_20], %57 {strides = array<i32>} : memref<1x4x8x8xbf16, #tpu.memory_space<vmem>>, vector<1x4x8x8xbf16>,
    %c0_21 = arith.constant 0 : index
    %c0_22 = arith.constant 0 : index
    %c0_23 = arith.constant 0 : index
    %c0_24 = arith.constant 0 : index
    %58 = vector.load %arg13[%c0_21, %c0_22, %c0_23, %c0_24] : memref<1x4x8x8xbf16, #tpu.memory_space<vmem>>, vector<1x4x8x8xbf16>
    %59 = vector.shape_cast %58 : vector<1x4x8x8xbf16> to vector<4x8x8xbf16>
    %60 = vector.shape_cast %32 : vector<4x8x8xbf16> to vector<1x4x8x8xbf16>
    tpu.vector_store %arg13[%c0_21, %c0_22, %c0_23, %c0_24], %60 {strides = array<i32>} : memref<1x4x8x8xbf16, #tpu.memory_space<vmem>>, vector<1x4x8x8xbf16>,
    "tpu.trace_start"() <{level = 10 : i32, message = "hqd,hkd->hqk"}> : () -> ()
    %cst_25 = arith.constant dense<0.000000e+00> : vector<4x8x8xf32>
    %61 = tpu.matmul %43, %54, %cst_25 {dimension_numbers = #tpu.dot_dimension_numbers<[2], [2], [1], [1], [0, 0, 0, 1, 1, 1], [0], [0]>} : vector<4x8x8xbf16>, vector<4x8x8xbf16>, vector<4x8x8xf32> -> vector<4x8x8xf32>
    "tpu.trace_stop"() : () -> ()
    %cst_26 = arith.constant 0.0883883461 : f32
    %62 = vector.broadcast %cst_26 : f32 to vector<4x8x8xf32>
    %63 = arith.mulf %61, %62 : vector<4x8x8xf32>
    %64 = vector.shape_cast %2 : vector<8x8xf32> to vector<1x8x8xf32>
    %65 = vector.broadcast %64 : vector<1x8x8xf32> to vector<4x8x8xf32>
    %66 = arith.addf %63, %65 : vector<4x8x8xf32>
    %cst_27 = arith.constant dense<0xFF800000> : vector<4x8xf32>
    %67 = vector.multi_reduction <maximumf>, %66, %cst_27 [2] : vector<4x8x8xf32> to vector<4x8xf32>
    %68 = vector.shape_cast %67 : vector<4x8xf32> to vector<4x8x1xf32>
    %69 = vector.broadcast %68 : vector<4x8x1xf32> to vector<4x8x8xf32>
    %70 = arith.subf %66, %69 : vector<4x8x8xf32>
    %71 = math.exp %70 : vector<4x8x8xf32>
    %cst_28 = arith.constant dense<0.000000e+00> : vector<4x8xf32>
    %72 = vector.multi_reduction <add>, %71, %cst_28 [2] : vector<4x8x8xf32> to vector<4x8xf32>
    %73 = vector.shape_cast %72 : vector<4x8xf32> to vector<4x8x1xf32>
    %74 = tpu.reciprocal %73 {approx = true} : vector<4x8x1xf32> -> vector<4x8x1xf32>
    %75 = vector.broadcast %74 : vector<4x8x1xf32> to vector<4x8x8xf32>
    %76 = arith.mulf %71, %75 : vector<4x8x8xf32>
    %77 = arith.truncf %76 : vector<4x8x8xf32> to vector<4x8x8xbf16>
    "tpu.trace_start"() <{level = 10 : i32, message = "hqk,hkd->hqd"}> : () -> ()
    %cst_29 = arith.constant dense<0.000000e+00> : vector<4x8x8xf32>
    %78 = tpu.matmul %77, %32, %cst_29 {dimension_numbers = #tpu.dot_dimension_numbers<[2], [1], [1], [2], [0, 0, 0, 1, 1, 2], [0], [0]>} : vector<4x8x8xbf16>, vector<4x8x8xbf16>, vector<4x8x8xf32> -> vector<4x8x8xf32>
    "tpu.trace_stop"() : () -> ()
    %79 = tpu.transpose %78, [1, 0, 2] : vector<4x8x8xf32> -> vector<8x4x8xf32>
    %80 = vector.shape_cast %79 : vector<8x4x8xf32> to vector<8x32xf32>
    %81 = arith.truncf %80 : vector<8x32xf32> to vector<8x32xbf16>
    %c0_30 = arith.constant 0 : index
    %c0_31 = arith.constant 0 : index
    %82 = vector.load %arg6[%c0_30, %c0_31] : memref<32x32xbf16, #tpu.memory_space<vmem>>, vector<32x32xbf16>
    %cst_32 = arith.constant dense<0.000000e+00> : vector<8x32xf32>
    %83 = tpu.matmul %81, %82, %cst_32 {dimension_numbers = #tpu.dot_dimension_numbers<[1], [0], [0], [1], [0, 0, 1, 1], [], []>} : vector<8x32xbf16>, vector<32x32xbf16>, vector<8x32xf32> -> vector<8x32xf32>
    %cst_33 = arith.constant 2.200000e-01 : f32
    %84 = vector.broadcast %cst_33 : f32 to vector<8x32xf32>
    %85 = arith.mulf %83, %84 : vector<8x32xf32>
    %86 = arith.addf %1, %85 : vector<8x32xf32>
    %c0_34 = arith.constant 0 : index
    %c0_35 = arith.constant 0 : index
    %87 = vector.load %arg8[%c0_34, %c0_35] : memref<1x32xf32, #tpu.memory_space<vmem>>, vector<1x32xf32>
    %88 = arith.mulf %86, %86 : vector<8x32xf32>
    %cst_36 = arith.constant dense<0.000000e+00> : vector<8xf32>
    %89 = vector.multi_reduction <add>, %88, %cst_36 [1] : vector<8x32xf32> to vector<8xf32>
    %90 = vector.shape_cast %89 : vector<8xf32> to vector<8x1xf32>
    %cst_37 = arith.constant 3.200000e+01 : f32
    %91 = vector.broadcast %cst_37 : f32 to vector<8x1xf32>
    %92 = arith.divf %90, %91 : vector<8x1xf32>
    %cst_38 = arith.constant 9.99999997E-7 : f32
    %93 = vector.broadcast %cst_38 : f32 to vector<8x1xf32>
    %94 = arith.addf %92, %93 : vector<8x1xf32>
    %95 = math.rsqrt %94 : vector<8x1xf32>
    %96 = vector.broadcast %95 : vector<8x1xf32> to vector<8x32xf32>
    %97 = arith.mulf %86, %96 : vector<8x32xf32>
    %98 = vector.broadcast %87 : vector<1x32xf32> to vector<8x32xf32>
    %99 = arith.mulf %97, %98 : vector<8x32xf32>
    %100 = arith.truncf %99 : vector<8x32xf32> to vector<8x32xbf16>
    %c0_39 = arith.constant 0 : index
    %c0_40 = arith.constant 0 : index
    %101 = vector.load %arg9[%c0_39, %c0_40] : memref<32x128xbf16, #tpu.memory_space<vmem>>, vector<32x128xbf16>
    %cst_41 = arith.constant dense<0.000000e+00> : vector<8x128xf32>
    %102 = tpu.matmul %100, %101, %cst_41 {dimension_numbers = #tpu.dot_dimension_numbers<[1], [0], [0], [1], [0, 0, 1, 1], [], []>} : vector<8x32xbf16>, vector<32x128xbf16>, vector<8x128xf32> -> vector<8x128xf32>
    %103 = vector.extract_strided_slice %102 {offsets = [0, 0], sizes = [8, 64], strides = [1, 1]} : vector<8x128xf32> to vector<8x64xf32>
    %104 = vector.extract_strided_slice %102 {offsets = [0, 64], sizes = [8, 64], strides = [1, 1]} : vector<8x128xf32> to vector<8x64xf32>
    %105 = arith.negf %103 : vector<8x64xf32>
    %106 = math.exp %105 : vector<8x64xf32>
    %cst_42 = arith.constant 1.000000e+00 : f32
    %107 = vector.broadcast %cst_42 : f32 to vector<8x64xf32>
    %108 = arith.addf %107, %106 : vector<8x64xf32>
    %109 = arith.divf %107, %108 : vector<8x64xf32>
    %110 = arith.mulf %103, %109 : vector<8x64xf32>
    %111 = arith.mulf %110, %104 : vector<8x64xf32>
    %112 = arith.truncf %111 : vector<8x64xf32> to vector<8x64xbf16>
    %c0_43 = arith.constant 0 : index
    %c0_44 = arith.constant 0 : index
    %113 = vector.load %arg10[%c0_43, %c0_44] : memref<64x32xbf16, #tpu.memory_space<vmem>>, vector<64x32xbf16>
    %cst_45 = arith.constant dense<0.000000e+00> : vector<8x32xf32>
    %114 = tpu.matmul %112, %113, %cst_45 {dimension_numbers = #tpu.dot_dimension_numbers<[1], [0], [0], [1], [0, 0, 1, 1], [], []>} : vector<8x64xbf16>, vector<64x32xbf16>, vector<8x32xf32> -> vector<8x32xf32>
    %cst_46 = arith.constant 2.200000e-01 : f32
    %115 = vector.broadcast %cst_46 : f32 to vector<8x32xf32>
    %116 = arith.mulf %114, %115 : vector<8x32xf32>
    %117 = arith.addf %86, %116 : vector<8x32xf32>
    %c0_47 = arith.constant 0 : index
    %c0_48 = arith.constant 0 : index
    %c0_49 = arith.constant 0 : index
    %118 = vector.load %arg11[%c0_47, %c0_48, %c0_49] : memref<1x8x32xf32, #tpu.memory_space<vmem>>, vector<1x8x32xf32>
    %119 = vector.shape_cast %118 : vector<1x8x32xf32> to vector<8x32xf32>
    %120 = vector.shape_cast %117 : vector<8x32xf32> to vector<1x8x32xf32>
    tpu.vector_store %arg11[%c0_47, %c0_48, %c0_49], %120 {strides = array<i32>} : memref<1x8x32xf32, #tpu.memory_space<vmem>>, vector<1x8x32xf32>,
    return
  }
  func.func @transform_0(%arg0: i32) -> (i32, i32, i32) {
    %c0_i32 = arith.constant 0 : i32
    %c0_i32_0 = arith.constant 0 : i32
    %c0_i32_1 = arith.constant 0 : i32
    return %arg0, %c0_i32, %c0_i32_0 : i32, i32, i32
  }
  func.func @transform_1(%arg0: i32) -> (i32, i32) {
    %c0_i32 = arith.constant 0 : i32
    %c0_i32_0 = arith.constant 0 : i32
    %c0_i32_1 = arith.constant 0 : i32
    return %c0_i32, %c0_i32_0 : i32, i32
  }
  func.func @transform_2(%arg0: i32) -> (i32, i32) {
    %c0_i32 = arith.constant 0 : i32
    %c0_i32_0 = arith.constant 0 : i32
    %c0_i32_1 = arith.constant 0 : i32
    return %c0_i32, %c0_i32_0 : i32, i32
  }
  func.func @transform_3(%arg0: i32) -> (i32, i32) {
    %c0_i32 = arith.constant 0 : i32
    %c0_i32_0 = arith.constant 0 : i32
    %c0_i32_1 = arith.constant 0 : i32
    return %c0_i32, %c0_i32_0 : i32, i32
  }
  func.func @transform_4(%arg0: i32) -> (i32, i32) {
    %c0_i32 = arith.constant 0 : i32
    %c0_i32_0 = arith.constant 0 : i32
    %c0_i32_1 = arith.constant 0 : i32
    return %c0_i32, %c0_i32_0 : i32, i32
  }
  func.func @transform_5(%arg0: i32) -> (i32, i32) {
    %c0_i32 = arith.constant 0 : i32
    %c0_i32_0 = arith.constant 0 : i32
    %c0_i32_1 = arith.constant 0 : i32
    return %c0_i32, %c0_i32_0 : i32, i32
  }
  func.func @transform_6(%arg0: i32) -> (i32, i32) {
    %c0_i32 = arith.constant 0 : i32
    %c0_i32_0 = arith.constant 0 : i32
    %c0_i32_1 = arith.constant 0 : i32
    return %c0_i32, %c0_i32_0 : i32, i32
  }
  func.func @transform_7(%arg0: i32) -> (i32, i32) {
    %c0_i32 = arith.constant 0 : i32
    %c0_i32_0 = arith.constant 0 : i32
    %c0_i32_1 = arith.constant 0 : i32
    return %c0_i32, %c0_i32_0 : i32, i32
  }
  func.func @transform_8(%arg0: i32) -> (i32, i32) {
    %c0_i32 = arith.constant 0 : i32
    %c0_i32_0 = arith.constant 0 : i32
    %c0_i32_1 = arith.constant 0 : i32
    return %c0_i32, %c0_i32_0 : i32, i32
  }
  func.func @transform_9(%arg0: i32) -> (i32, i32) {
    %c0_i32 = arith.constant 0 : i32
    %c0_i32_0 = arith.constant 0 : i32
    %c0_i32_1 = arith.constant 0 : i32
    return %c0_i32, %c0_i32_0 : i32, i32
  }
  func.func @transform_10(%arg0: i32) -> (i32, i32, i32) {
    %c0_i32 = arith.constant 0 : i32
    %c0_i32_0 = arith.constant 0 : i32
    %c0_i32_1 = arith.constant 0 : i32
    return %arg0, %c0_i32, %c0_i32_0 : i32, i32, i32
  }
  func.func @transform_11(%arg0: i32) -> (i32, i32, i32, i32) {
    %c0_i32 = arith.constant 0 : i32
    %c0_i32_0 = arith.constant 0 : i32
    %c0_i32_1 = arith.constant 0 : i32
    %c0_i32_2 = arith.constant 0 : i32
    return %arg0, %c0_i32, %c0_i32_0, %c0_i32_1 : i32, i32, i32, i32
  }
  func.func @transform_12(%arg0: i32) -> (i32, i32, i32, i32) {
    %c0_i32 = arith.constant 0 : i32
    %c0_i32_0 = arith.constant 0 : i32
    %c0_i32_1 = arith.constant 0 : i32
    %c0_i32_2 = arith.constant 0 : i32
    return %arg0, %c0_i32, %c0_i32_0, %c0_i32_1 : i32, i32, i32, i32
  }
}

</mosaic_0001>

<bundles_post_ra>
// kernel: granite_decoder_layer.1
= control target key start
LH: loop header
LB: loop body
LE: loop exit
PB: predicated region body
PF: predicated region fallthrough
CT: control target
= control target key end

     0   :  { %18 = vsyncpa [#allocation3], 0  ;;  %s3259_s0 = inlined_call_operand.vmem [shape: f32[2,8,32], index: 0, kind: input, shape index: {}]   ;;  %s3260_s1 = inlined_call_operand.vmem [shape: f32[8,8], index: 1, kind: input, shape index: {}]   ;;  %s3261_s2 = inlined_call_operand.vmem [shape: f32[8,8], index: 2, kind: input, shape index: {}]   ;;  %s3262_s3 = inlined_call_operand.vmem [shape: f32[8,8], index: 3, kind: input, shape index: {}]   ;;  %s3263_s4 = inlined_call_operand.vmem [shape: bf16[32,96], index: 4, kind: input, shape index: {}]   ;;  %s3264_s5 = inlined_call_operand.hbm [shape: bf16[32,32], index: 5, kind: input, shape index: {}]   ;;  %s3265_s6 = inlined_call_operand.vmem [shape: f32[1,32], index: 6, kind: input, shape index: {}]   ;;  %s3266_s7 = inlined_call_operand.vmem [shape: f32[1,32], index: 7, kind: input, shape index: {}]   ;;  %s3267_s8 = inlined_call_operand.hbm [shape: bf16[32,128], index: 8, kind: input, shape index: {}]   ;;  %s3268_s9 = inlined_call_operand.vmem [shape: bf16[64,32], index: 9, kind: input, shape index: {}]   ;;  %s3269_s10 = inlined_call_operand.hbm [shape: f32[2,8,32], index: 10, kind: output, shape index: {0}]   ;;  %s3270_s11 = inlined_call_operand.hbm [shape: bf16[2,4,8,8], index: 11, kind: output, shape index: {1}]   ;;  %s3271_s12 = inlined_call_operand.hbm [shape: bf16[2,4,8,8], index: 12, kind: output, shape index: {2}]  }
   0x1   :  { %19 = vsyncpa [#allocation6], 0 }
   0x2   :  { %20 = vsyncpa [#allocation4], 0 }
   0x3   :  { %22 = vsyncpa [#allocation4 + $0x1], 0 }
   0x4   :  { %23 = vsyncpa [#allocation9], 0 }
   0x5   :  { %25 = vsyncpa [#allocation9 + $0x1], 0  ;;  %s2680_s21 = smov 0   ;;  %s2682_s22 = smov 0  }
   0x6   :  { %s2684_s23 = smov 0   ;;  %s2686_s24 = smov 0  }
   0x7 LB: > { %3286 = sst [smem:[#allocation15_spill]] %s2580_s21  ;;  %s2701_s25 = sadd.s32 4294967295, %s2592_s24   ;;  %s2592_s24 = sphi %s2686_s24, %s3309_s24   ;;  %s2588_s23 = sphi %s2684_s23, %s3311_s23   ;;  %s2584_s22 = sphi %s2682_s22, %s3313_s22   ;;  %s2580_s21 = sphi %s2680_s21, %s3312_s21  }
   0x8   : > { %3287 = sst [smem:[#allocation16_spill]] %s2588_s23  ;;  %s3272_s26 = sadd.s32 4294967294, %s2592_s24  }
   0x9   : > { %3288 = sst [smem:[#allocation17_spill]] %s2592_s24  ;;  %s2705_s27 = sadd.s32 1, %s2592_s24  }
   0xa   : > { %3289 = sst [smem:[#allocation18_spill]] %s2705_s27  ;;  %s253_s28 = sadd.s32 1, %s2588_s23 }
   0xb   : > { %s250_s29 = ssub.s32 %s2592_s24, %s2705_s27  ;;  %p263_p0 = scmp.ne.s32.totalorder %s2588_s23, %s2584_s22 }
   0xc   : > { %p251_p1 = scmp.eq.s32.totalorder %s250_s29, 0  ;;  %p264_p2 = scmp.eq.s32.totalorder %s2701_s25, 1 }
   0xd   : > { %p269_p3 = scmp.ne.s32.totalorder %s2584_s22, %s2580_s21  ;;  %p270_p4 = scmp.eq.s32.totalorder %s3272_s26, 1 }
   0xe   : > { %s2718_s30 = scalar_select %p251_p1, %s2588_s23, %s253_s28  }
   0xf   : > { %p2720_p5 = por %p264_p2, %p263_p0  ;;  %p2724_p6 = por %p270_p4, %p269_p3 }
  0x10   : > { %3290 = sst [smem:[#allocation19_spill]] %s2718_s30  ;;  %p2116_p7 = scmp.ge.s32.totalorder %s2592_s24, 1 }
  0x11   : > { %s3291_s13 = scalar_select %p2720_p5, 1, 0 }
  0x12   : > { %s3292_s14 = scalar_select %p2724_p6, 1, 0 }
  0x13   : > { %p329_p8 = scmp.lt.s32.totalorder %s2592_s24, 3  ;;  %p3276_p9 = scmp.eq.s32.totalorder %s2701_s25, 0 }
  0x14   : > { %3293 = sst [smem:[#allocation20_spill]] %s3292_s14  ;;  %s2594_s16 = smov [#allocation2]  }
  0x15   : > { %p2731_p10 = pnand %p2116_p7, %p329_p8  ;;  %s353_s17 = sshll.u32 %s2594_s16, 4  ;;  %s354_s17 = int_to_ptr.vmem [resolvable:$true] %s353_s17 }
  0x16   : > { %s2595_s19 = smov [#allocation5]   ;;  %s2406_s26 = scalar_lea.hbm %s3264_s5, 256 }
  0x17   : > { %s3294_s15 = scalar_select %p2731_p10, 1, 0 }
  0x18   : > { %p2300_p11 = pneg %p2731_p10  ;;  %s372_s20 = sshll.u32 %s2595_s19, 4  ;;  %s2743_s20 = int_to_ptr.vmem [resolvable:$true] %s372_s20 }
  0x19   : > { %p2407_p13 = scmp.ne.s32.totalorder %s3264_s5, %s2406_s26  ;;  %p2413_p3 = scmp.lt.u32.totalorder %s2406_s26, %s3264_s5 }
  0x1a   : > { %p2739_p12 = pnand %p3276_p9, %p2300_p11 }
  0x1c   : > { %p2408_p0 = pneg %p2739_p12 }
  0x1e   : > { %p2409_p1 = pnand %p2408_p0, %p2407_p13 }
  0x20   : > { %p2410_p2 = pneg %p2409_p1 }
  0x22   : > { %p2415_p4 = pnand %p2413_p3, %p2410_p2 }
  0x24   : > { %2418 = shalt.err (!%p2415_p4)
}
  0x25   : > { %s2419_s19 = scalar_lea.vmem %s354_s17, 256  ;;  %p2427_p9 = scmp.lt.s32.totalorder %s354_s17, %s354_s17 }
  0x26   : > { %p2420_p7 = scmp.ne.s32.totalorder %s354_s17, %s2419_s19  ;;  %p2428_p6 = scmp.lt.s32.totalorder %s2419_s19, %s2419_s19 }
  0x28   : > { %p2422_p8 = pnand %p2420_p7, %p2408_p0  ;;  %p2429_p5 = por %p2428_p6, %p2427_p9 }
  0x2a   : > { %p2423_p11 = pneg %p2422_p8 }
  0x2c   : > { %p2430_p10 = pnand %p2429_p5, %p2423_p11 }
  0x2e   : > { %2433 = shalt.err (!%p2430_p10)
}
  0x2f   : > { %s2596_s30 = smov 64   ;;  %s2597_s28 = smov 4  }
  0x30   : > { %2303 = dma.hbm_to_vmem [thread:$0]  (!%p2739_p12), %s3264_s5, 256, %s354_s17, [#allocation3], %s2596_s30, %s2596_s30, %s2597_s28  }
  0x31   : > { %s2434_s16 = scalar_lea.hbm %s3267_s8, 256 }
  0x32   : > { %p2435_p13 = scmp.ne.s32.totalorder %s3267_s8, %s2434_s16  ;;  %p2441_p9 = scmp.lt.u32.totalorder %s2434_s16, %s3267_s8 }
  0x34   : > { %p2437_p5 = pnand %p2435_p13, %p2408_p0 }
  0x36   : > { %p2438_p6 = pneg %p2437_p5 }
  0x38   : > { %p2443_p10 = pnand %p2441_p9, %p2438_p6 }
  0x3a   : > { %2446 = shalt.err (!%p2443_p10)
}
  0x3b   : > { %s2447_s17 = scalar_lea.vmem %s2743_s20, 256  ;;  %p2455_p4 = scmp.lt.s32.totalorder %s2743_s20, %s2743_s20 }
  0x3c   : > { %p2448_p1 = scmp.ne.s32.totalorder %s2743_s20, %s2447_s17  ;;  %p2456_p7 = scmp.lt.s32.totalorder %s2447_s17, %s2447_s17 }
  0x3e   : > { %p2450_p2 = pnand %p2448_p1, %p2408_p0  ;;  %p2457_p8 = por %p2456_p7, %p2455_p4 }
  0x40   : > { %p2451_p3 = pneg %p2450_p2 }
  0x42   : > { %p2458_p11 = pnand %p2457_p8, %p2451_p3 }
  0x44   : > { %2461 = shalt.err (!%p2458_p11)
}
  0x45   : > { %2306 = dma.hbm_to_vmem [thread:$0]  (!%p2739_p12), %s3267_s8, 256, %s2743_s20, [#allocation6], %s2596_s30, %s2596_s30, %s2597_s28  }
  0x46   : > { %p3296_p13 = scmp.ne.s32.totalorder %s3294_s15, 0 }
  0x47   : > { %p3297_p5 = scmp.eq.s32.totalorder (!%p3296_p13), %s2701_s25, 0 }
  0x48   : > { %398 = sbr.rel (%p3296_p13) target bundleno = 2740 (0xab4), region = 60 }
  0x4f   : > { %2563 = dma.done.wait (%p3297_p5), [#allocation3], 256   ;;  %p3298_p0 = pmov %p3297_p5 }
  0x51   : > { %2565 = vsyncadd (%p3298_p0), [#allocation3], 4294967040  ;;  %p3299_p6 = pmov %p3298_p0 }
  0x52   : > { %p3300_p9 = pmov %p3298_p0 }
  0x53   : > { %2567 = dma.done.wait (%p3299_p6), [#allocation6], 256  }
  0x54   : > { %2569 = vsyncadd (%p3300_p9), [#allocation6], 4294967040  ;;  %p453_p10 = scmp.lt.s32.totalorder %s2701_s25, 1  ;;  %vm464_vm0 = vcmask 261120   ;;  %v2372_v3 = vld [vmem:[%s3263_s4] sm:$0xff]   ;;  %v2598_v4 = vmov 0.0   ;;  %v555_v20 = vlaneseq }
  0x55   : > { %2202 = vmatprep.subr.bf16.mxu0 %v2598_v4  ;;  %vm2599_vm1 = vmmov 0   ;;  %v2373_v5 = vld [vmem:[%s3263_s4 + $0x8] sm:$0xff]   ;;  %2210 = vmatprep.subr.bf16.mxu1 %v2598_v4  ;;  %v2127_v10 = vld [vmem:[%s3265_s6] ss:$0 sm:$0xff]  ;;  %s2600_s19 = smov 112   ;;  %s2601_s17 = smov 120  }
  0x56   : > { %s454_s14 = scalar_select %p453_p10, %s2701_s25, 1  ;;  %2206 = vmatprep.mubr.msk.bf16.mxu0 %vm2599_vm1, %v2598_v4  ;;  %2203 = vmatpush3.bf16.msra.mxu0 %v2372_v3  ;;  %v2604_v18 = vmov 1983009808   ;;  %v2605_v21 = vmov 1934713408   ;;  %v556_v24 = vshrl.u32 %v555_v20, 7 }
  0x57   : > { %2204 = vmatprep.subr.bf16.mxu0 %v2598_v4  ;;  %2212 = vmatprep.mubr.msk.bf16.mxu1 %vm2599_vm1, %v2598_v4  ;;  %s2602_s21 = smov 104   ;;  %s2603_s24 = smov 96   ;;  %v553_v19 = vunpack.c.l.s4 %v2604_v18  ;;  %v585_v22 = vunpack.c.l.s4 %v2605_v21  ;;  %vm1022_vm2 = vcmask 31744   ;;  %vm1099_vm3 = vcmask 60416  }
  0x58   : > { %s2126_s18 = sshll.u32 %s454_s14, 3  ;;  %s2606_s14 = smov 4   ;;  %vm1108_vm4 = vcmask 64512   ;;  %vm1352_vm5 = vcmask 1043456   ;;  %vm1683_vm6 = vcmask 130048   ;;  %vm1685_vm7 = vcmask 195584  }
  0x59   : > { %s456_s30 = scalar_lea.vmem %s3259_s0, %s2126_s18  ;;  %v554_v23 = vunpack.c.0.s8 %v553_v19  ;;  %v586_v27 = vunpack.c.0.s8 %v585_v22  ;;  %s2607_s18 = smov 124   ;;  %vm1870_vm8 = vcmask 523264  }
  0x5a   : > { %v2807_v0 = vld [vmem:[%s456_s30] sm:$0xff]  ;;  %2205 = vmatpush3.bf16.msra.mxu0 %v2373_v5  ;;  %s2925_s20 = sand.u32 1, %s2584_s22   ;;  %s1922_s15 = sand.u32 1, %s2701_s25  }
  0x5b   : > { %v463_v1 = vmul.f32 %v2807_v0, %v2807_v0  ;;  %2216 = vmatprep.subr.bf16.mxu0 %v2598_v4  ;;  %v2844_v28 = vsub.s32 %v554_v23, %v556_v24  ;;  %v2857_v34 = vsub.s32 %v586_v27, %v556_v24  ;;  %s2124_s26 = sshll.u32 %s2925_s20, 4  ;;  %s3285_s30 = sshll.u32 %s2701_s25, 8 }
  0x5c   : > { %s2954_s27 = scalar_lea.vmem [#allocation8], %s2124_s26  ;;  %p3301_p1 = scmp.ne.s32.totalorder %s3291_s13, 0 }
  0x5d   : > { %v465_v2 = vsel %vm464_vm0, %v463_v1, 0.0  ;;  %s1954_s16 = sshll.u32 %s2954_s27, 4  ;;  %s3142_s16 = int_to_ptr.vmem [resolvable:$true] %s1954_s16 }
  0x5e   : > { %466 = vadd.xlane.f32.xlu0 %v465_v2 }
  0xeb   : > { %v467_v6 = vpop.xlane.xlu0 %466 }
  0xec   : > { %v469_v7 = vmul.f32 0.03125, %v467_v6 }
  0xee   : > { %v470_v8 = vadd.f32 1e-06, %v469_v7 }
  0xf0   : > { %2382 = vrsqrt.f32 %v470_v8 }
  0xfa   : > { %v2383_v9 = vpop.eup %2382 }
  0xfb   : > { %v472_v11 = vmul.f32 %v2383_v9, %v2807_v0 }
  0xfd   : > { %v479_v12 = vmul.f32 %v2127_v10, %v472_v11 }
  0xff   : > { %v480_v13 = vpack.c.bf16 %v479_v12, %v479_v12 }
 0x101   : > { %2207 = vmatmul.mubr.msk.bf16.vlgmr.msra.gmra.mrb[0].mxu0 %vm464_vm0, %v480_v13 }
 0x102   : > { %2218 = vmatprep.mubr.msk.bf16.mxu0 %vm2599_vm1, %v2598_v4 }
 0x1d4   : > { %v2833_v14 = vpop.f32.mrb[0].mxu0 }
 0x1d5   : > { %544 = vrot.lane.b32.xlu1 %v2833_v14, %s2600_s19  ;;  %541 = vrot.lane.b32.xlu0 %v2833_v14, %s2601_s17  ;;  %v2208_v15 = vpop.f32.mrb[1].mxu0  ;;  %s3283_s19 = smov 64   ;;  %s3049_s17 = scalar_lea.vmem [#allocation10], %s2124_s26 }
 0x1d6   : > { %v537_v16 = vpop.f32.mrb[2].mxu0  ;;  %s3138_s26 = scalar_lea.hbm %s3270_s11, %s3285_s30  ;;  %s1970_s29 = sshll.u32 %s3049_s17, 4  ;;  %s3173_s29 = int_to_ptr.vmem [resolvable:$true] %s1970_s29 }
 0x1d7   : > { %v2209_v17 = vpop.f32.mrb[3].mxu0 }
 0x1d9   : > { %547 = vrot.lane.b32.xlu1 %v2833_v14, %s2602_s21  ;;  %s2609_s21 = smov 16  }
 0x1dd   : > { %686 = vrot.lane.b32.xlu1 %v2833_v14, %s2603_s24 }
 0x247   : > { %v2839_v25 = vpop.permute.xlu1 %544  ;;  %v2841_v26 = vpop.permute.xlu0 %541 }
 0x248   : > { %688 = vrot.lane.b32.xlu1 %v2841_v26, %s2603_s24  ;;  %v550_v29 = vcombine.low %v2833_v14, %v2839_v25  ;;  %v551_v30 = vcombine.high %v2833_v14, %v2839_v25 }
 0x24a   : > { %v558_v35 = vrot.slane %v550_v29, %v2844_v28  ;;  %v565_v36 = vrot.slane %v551_v30, %v2844_v28 }
 0x24b   : > { %v2850_v31 = vpop.permute.xlu1 %547 }
 0x24c   : > { %v566_v32 = vcombine.low %v2841_v26, %v2850_v31  ;;  %v567_v33 = vcombine.high %v2841_v26, %v2850_v31  ;;  %690 = vrot.lane.b32.xlu1 %v2839_v25, %s2603_s24 }
 0x24e   : > { %v574_v37 = vrot.slane %v566_v32, %v2844_v28  ;;  %v581_v38 = vrot.slane %v567_v33, %v2844_v28 }
 0x24f   : > { %v687_v7 = vpop.permute.xlu1 %686 }
 0x250   : > { %v582_v39 = vcombine.low %v558_v35, %v574_v37  ;;  %v583_v40 = vcombine.high %v558_v35, %v574_v37  ;;  %v598_v41 = vcombine.low %v565_v36, %v581_v38  ;;  %v599_v42 = vcombine.high %v565_v36, %v581_v38  ;;  %692 = vrot.lane.b32.xlu1 %v2850_v31, %s2603_s24  ;;  %s2610_s24 = smov 8  }
 0x252   : > { %v590_v43 = vrot.slane %v582_v39, %v2857_v34  ;;  %v597_v44 = vrot.slane %v583_v40, %v2857_v34  ;;  %v606_v45 = vrot.slane %v598_v41, %v2857_v34  ;;  %v613_v46 = vrot.slane %v599_v42, %v2857_v34 }
 0x254   : > { %v618_v47 = vcombine.low %v590_v43, %v597_v44  ;;  %v2131_v48 = vcombine.high %v590_v43, %v597_v44  ;;  %v634_v49 = vcombine.low %v606_v45, %v613_v46  ;;  %v2132_v50 = vcombine.high %v606_v45, %v613_v46 }
 0x256   : > { %v625_v51 = vrot.slane %v618_v47, %v2844_v28  ;;  %v633_v52 = vrot.slane %v2131_v48, %v2844_v28  ;;  %v641_v53 = vrot.slane %v634_v49, %v2844_v28  ;;  %v649_v54 = vrot.slane %v2132_v50, %v2844_v28 }
 0x258   : > { %v650_v55 = vcombine.low %v625_v51, %v633_v52  ;;  %v651_v56 = vcombine.high %v625_v51, %v633_v52  ;;  %v666_v57 = vcombine.low %v641_v53, %v649_v54  ;;  %v667_v58 = vcombine.high %v641_v53, %v649_v54 }
 0x25a   : > { %v658_v59 = vrot.slane %v650_v55, %v2857_v34  ;;  %v674_v60 = vrot.slane %v666_v57, %v2857_v34  ;;  %v665_v61 = vrot.slane %v651_v56, %v2857_v34  ;;  %v681_v62 = vrot.slane %v667_v58, %v2857_v34 }
 0x25c   : > { %v2876_v63 = vcombine.high %v658_v59, %v674_v60  ;;  %v2878_v1 = vcombine.low %v658_v59, %v674_v60  ;;  %v2880_v2 = vcombine.high %v665_v61, %v681_v62  ;;  %v2882_v3 = vcombine.low %v665_v61, %v681_v62 }
 0x25e   : > { %1012 = vrot.lane.b32.xlu0 %v2876_v63, %s2606_s14  ;;  %1010 = vrot.lane.b32.xlu1 %v2878_v1, %s2606_s14  ;;  %v987_v5 = vsub.f32 0.0, %v2876_v63  ;;  %v986_v6 = vsub.f32 0.0, %v2878_v1  ;;  %v989_v57 = vsub.f32 0.0, %v2880_v2  ;;  %v988_v58 = vsub.f32 0.0, %v2882_v3 }
 0x262   : > { %996 = vrot.lane.b32.xlu0 %v987_v5, %s2607_s18  ;;  %994 = vrot.lane.b32.xlu1 %v986_v6, %s2607_s18 }
 0x2ba   : > { %v689_v8 = vpop.permute.xlu1 %688 }
 0x2be   : > { %v691_v9 = vpop.permute.xlu1 %690 }
 0x2bf   : > { %v698_v10 = vcombine.low %v687_v7, %v691_v9  ;;  %v699_v11 = vcombine.high %v687_v7, %v691_v9  ;;  %v2930_v9 = vld [vmem:[%s3261_s2] sm:$0xff] }
 0x2c1   : > { %v706_v16 = vrot.slane %v698_v10, %v2844_v28  ;;  %v713_v17 = vrot.slane %v699_v11, %v2844_v28  ;;  %v2935_v10 = vld [vmem:[%s3262_s3] sm:$0xff] }
 0x2c2   : > { %v693_v12 = vpop.permute.xlu1 %692 }
 0x2c3   : > { %v714_v13 = vcombine.low %v689_v8, %v693_v12  ;;  %v715_v15 = vcombine.high %v689_v8, %v693_v12 }
 0x2c5   : > { %v722_v18 = vrot.slane %v714_v13, %v2844_v28  ;;  %v729_v19 = vrot.slane %v715_v15, %v2844_v28 }
 0x2c7   : > { %v730_v20 = vcombine.low %v706_v16, %v722_v18  ;;  %v731_v21 = vcombine.high %v706_v16, %v722_v18  ;;  %v746_v22 = vcombine.low %v713_v17, %v729_v19  ;;  %v747_v23 = vcombine.high %v713_v17, %v729_v19 }
 0x2c9   : > { %v738_v24 = vrot.slane %v730_v20, %v2857_v34  ;;  %v745_v27 = vrot.slane %v731_v21, %v2857_v34  ;;  %v754_v29 = vrot.slane %v746_v22, %v2857_v34  ;;  %v761_v30 = vrot.slane %v747_v23, %v2857_v34 }
 0x2cb   : > { %v766_v32 = vcombine.low %v738_v24, %v745_v27  ;;  %v2133_v33 = vcombine.high %v738_v24, %v745_v27  ;;  %v782_v35 = vcombine.low %v754_v29, %v761_v30  ;;  %v2134_v36 = vcombine.high %v754_v29, %v761_v30 }
 0x2cd   : > { %v773_v37 = vrot.slane %v766_v32, %v2844_v28  ;;  %v781_v38 = vrot.slane %v2133_v33, %v2844_v28  ;;  %v789_v39 = vrot.slane %v782_v35, %v2844_v28  ;;  %v797_v40 = vrot.slane %v2134_v36, %v2844_v28 }
 0x2ce   : > { %v1028_v32 = vmul.f32 %v2876_v63, %v2930_v9  ;;  %v1027_v33 = vmul.f32 %v2878_v1, %v2930_v9 }
 0x2cf   : > { %v798_v41 = vcombine.low %v773_v37, %v781_v38  ;;  %v814_v42 = vcombine.low %v789_v39, %v797_v40  ;;  %v799_v47 = vcombine.high %v773_v37, %v781_v38  ;;  %v815_v48 = vcombine.high %v789_v39, %v797_v40 }
 0x2d0   : > { %v1013_v59 = vpop.permute.xlu0 %1012  ;;  %v1011_v60 = vpop.permute.xlu1 %1010 }
 0x2d1   : > { %v806_v43 = vrot.slane %v798_v41, %v2857_v34  ;;  %v822_v44 = vrot.slane %v814_v42, %v2857_v34  ;;  %v813_v51 = vrot.slane %v799_v47, %v2857_v34  ;;  %v829_v52 = vrot.slane %v815_v48, %v2857_v34 }
 0x2d3   : > { %v831_v45 = vcombine.high %v806_v43, %v822_v44  ;;  %v830_v46 = vcombine.low %v806_v43, %v822_v44  ;;  %v833_v53 = vcombine.high %v813_v51, %v829_v52  ;;  %v832_v54 = vcombine.low %v813_v51, %v829_v52 }
 0x2d4   : > { %v997_v61 = vpop.permute.xlu0 %996  ;;  %v995_v62 = vpop.permute.xlu1 %994 }
 0x2d5   : > { %1069 = vrot.lane.b32.xlu0 %v831_v45, %s2606_s14  ;;  %1067 = vrot.lane.b32.xlu1 %v830_v46, %s2606_s14  ;;  %v1044_v49 = vsub.f32 0.0, %v831_v45  ;;  %v1043_v50 = vsub.f32 0.0, %v830_v46  ;;  %v1046_v55 = vsub.f32 0.0, %v833_v53  ;;  %v1045_v56 = vsub.f32 0.0, %v832_v54 }
 0x2d6   : > { %v1024_v11 = vsel %vm1022_vm2, %v997_v61, %v1013_v59  ;;  %v1084_v15 = vmul.f32 %v831_v45, %v2930_v9  ;;  %v1083_v18 = vmul.f32 %v830_v46, %v2930_v9  ;;  %v1023_v19 = vsel %vm1022_vm2, %v995_v62, %v1011_v60 }
 0x2d7   : > { %v1032_v24 = vmul.f32 %v1024_v11, %v2935_v10  ;;  %v1031_v27 = vmul.f32 %v1023_v19, %v2935_v10  ;;  %v1086_v35 = vmul.f32 %v833_v53, %v2930_v9  ;;  %v1085_v37 = vmul.f32 %v832_v54, %v2930_v9 }
 0x2d8   : > { %v1029_v61 = vmul.f32 %v2882_v3, %v2930_v9 }
 0x2d9   : > { %1053 = vrot.lane.b32.xlu0 %v1044_v49, %s2607_s18  ;;  %1051 = vrot.lane.b32.xlu1 %v1043_v50, %s2607_s18  ;;  %v1036_v1 = vadd.f32 %v1032_v24, %v1028_v32  ;;  %v1035_v42 = vadd.f32 %v1031_v27, %v1027_v33 }
 0x2db   : > { %v1040_v49 = vpack.c.bf16 %v1036_v1, %v1036_v1  ;;  %v1039_v50 = vpack.c.bf16 %v1035_v42, %v1035_v42 }
 0x2dd   : > { %1073 = vrot.lane.b32.xlu0 %v833_v53, %s2606_s14  ;;  %1071 = vrot.lane.b32.xlu1 %v832_v54, %s2606_s14 }
 0x2e1   : > { %1057 = vrot.lane.b32.xlu0 %v1046_v55, %s2607_s18  ;;  %1055 = vrot.lane.b32.xlu1 %v1045_v56, %s2607_s18 }
 0x2e5   : > { %1000 = vrot.lane.b32.xlu0 %v989_v57, %s2607_s18  ;;  %998 = vrot.lane.b32.xlu1 %v988_v58, %s2607_s18  ;;  %v1030_v57 = vmul.f32 %v2880_v2, %v2930_v9  ;;  %v459_v9 = vld [vmem:[%s3260_s1] sm:$0xff]  ;;  %s2611_s18 = smov 24  }
 0x2e9   : > { %1016 = vrot.lane.b32.xlu0 %v2880_v2, %s2606_s14  ;;  %1014 = vrot.lane.b32.xlu1 %v2882_v3, %s2606_s14 }
 0x347   : > { %v1070_v5 = vpop.permute.xlu0 %1069  ;;  %v1068_v6 = vpop.permute.xlu1 %1067 }
 0x34b   : > { %v1054_v7 = vpop.permute.xlu0 %1053  ;;  %v1052_v8 = vpop.permute.xlu1 %1051 }
 0x34c   : > { %v1080_v12 = vsel %vm1022_vm2, %v1054_v7, %v1070_v5  ;;  %v1079_v13 = vsel %vm1022_vm2, %v1052_v8, %v1068_v6 }
 0x34d   : > { %v1088_v16 = vmul.f32 %v1080_v12, %v2935_v10  ;;  %v1087_v17 = vmul.f32 %v1079_v13, %v2935_v10 }
 0x34f   : > { %v1092_v20 = vadd.f32 %v1088_v16, %v1084_v15  ;;  %v1074_v21 = vpop.permute.xlu0 %1073  ;;  %v1072_v22 = vpop.permute.xlu1 %1071  ;;  %v1091_v23 = vadd.f32 %v1087_v17, %v1083_v18 }
 0x351   : > { %v1096_v29 = vpack.c.bf16 %v1092_v20, %v1092_v20  ;;  %v1095_v30 = vpack.c.bf16 %v1091_v23, %v1091_v23 }
 0x353   : > { %1101 = vst.msk [vmem:[%s2954_s27 + $0x4] sm:$0xf] %vm1099_vm3, %v1096_v29  ;;  %v1058_v36 = vpop.permute.xlu0 %1057  ;;  %v1056_v38 = vpop.permute.xlu1 %1055  ;;  %1100 = vst.msk [vmem:[%s2954_s27] sm:$0xf] %vm1099_vm3, %v1095_v30  ;;  %v1113_v63 = vsel %vm1108_vm4, %v1095_v30, 0  ;;  %v1159_v39 = vsel %vm1108_vm4, %v1096_v29, 0 }
 0x354   : > { %v1082_v40 = vsel %vm1022_vm2, %v1058_v36, %v1074_v21  ;;  %v1081_v41 = vsel %vm1022_vm2, %v1056_v38, %v1072_v22  ;;  %2211 = vmatpush3.bf16.xpose.msra.mxu1 %v1113_v63  ;;  %2217 = vmatpush3.bf16.xpose.msra.mxu0 %v1159_v39 }
 0x355   : > { %v1090_v43 = vmul.f32 %v1082_v40, %v2935_v10  ;;  %v1089_v44 = vmul.f32 %v1081_v41, %v2935_v10  ;;  %2228 = vmatprep.subr.bf16.mxu0 %v2598_v4  ;;  %2222 = vmatprep.subr.bf16.mxu1 %v2598_v4 }
 0x357   : > { %v1094_v45 = vadd.f32 %v1090_v43, %v1086_v35  ;;  %v1093_v46 = vadd.f32 %v1089_v44, %v1085_v37  ;;  %v1001_v47 = vpop.permute.xlu0 %1000  ;;  %v999_v48 = vpop.permute.xlu1 %998 }
 0x359   : > { %v1098_v51 = vpack.c.bf16 %v1094_v45, %v1094_v45  ;;  %v1097_v52 = vpack.c.bf16 %v1093_v46, %v1093_v46 }
 0x35b   : > { %1103 = vst.msk [vmem:[%s2954_s27 + $0xc] sm:$0xf] %vm1099_vm3, %v1098_v51  ;;  %1102 = vst.msk [vmem:[%s2954_s27 + $0x8] sm:$0xf] %vm1099_vm3, %v1097_v52  ;;  %2219 = vmatmul.mubr.msk.bf16.vlgmr.msra.gmra.mrb[4].mxu0 %vm1108_vm4, %v1040_v49  ;;  %v1017_v53 = vpop.permute.xlu0 %1016  ;;  %2213 = vmatmul.mubr.msk.bf16.vlgmr.msra.gmra.mrb[0].mxu1 %vm1108_vm4, %v1039_v50  ;;  %v1015_v54 = vpop.permute.xlu1 %1014  ;;  %v1205_v55 = vsel %vm1108_vm4, %v1097_v52, 0  ;;  %v1251_v56 = vsel %vm1108_vm4, %v1098_v51, 0 }
 0x35c   : > { %v1026_v58 = vsel %vm1022_vm2, %v1001_v47, %v1017_v53  ;;  %v1025_v59 = vsel %vm1022_vm2, %v999_v48, %v1015_v54  ;;  %2223 = vmatpush3.bf16.xpose.msra.mxu1 %v1205_v55  ;;  %2229 = vmatpush3.bf16.xpose.msra.mxu0 %v1251_v56 }
 0x35d   : > { %v1034_v60 = vmul.f32 %v1026_v58, %v2935_v10  ;;  %v1033_v62 = vmul.f32 %v1025_v59, %v2935_v10  ;;  %2224 = vmatprep.mubr.msk.bf16.mxu1 %vm2599_vm1, %v2598_v4  ;;  %2230 = vmatprep.mubr.msk.bf16.mxu0 %vm2599_vm1, %v2598_v4 }
 0x35e   : > { %2234 = vmatprep.subr.bf16.mxu1 %v2598_v4  ;;  %2240 = vmatprep.subr.bf16.mxu0 %v2598_v4 }
 0x35f   : > { %v1038_v2 = vadd.f32 %v1034_v60, %v1030_v57  ;;  %v1037_v5 = vadd.f32 %v1033_v62, %v1029_v61 }
 0x361   : > { %v1042_v6 = vpack.c.bf16 %v1038_v2, %v1038_v2  ;;  %v1041_v7 = vpack.c.bf16 %v1037_v5, %v1037_v5 }
 0x363   : > { %2225 = vmatmul.mubr.msk.bf16.vlgmr.msra.gmra.mrb[4].mxu1 %vm1108_vm4, %v1041_v7  ;;  %2231 = vmatmul.mubr.msk.bf16.vlgmr.msra.gmra.mrb[8].mxu0 %vm1108_vm4, %v1042_v6 }
 0x364   : > { %2236 = vmatprep.mubr.msk.bf16.mxu1 %vm2599_vm1, %v2598_v4  ;;  %2242 = vmatprep.mubr.msk.bf16.mxu0 %vm2599_vm1, %v2598_v4 }
 0x42e   : > { %v1149_v3 = vpop.f32.mrb[0].mxu1  ;;  %v1195_v8 = vpop.f32.mrb[4].mxu0 }
 0x42f   : > { %v1293_v10 = vmul.f32 0.088388346, %v1149_v3  ;;  %v1294_v11 = vmul.f32 0.088388346, %v1195_v8  ;;  %v2214_v12 = vpop.f32.mrb[1].mxu1  ;;  %v2220_v13 = vpop.f32.mrb[5].mxu0 }
 0x430   : > { %v1152_v15 = vpop.f32.mrb[2].mxu1  ;;  %v1198_v16 = vpop.f32.mrb[6].mxu0 }
 0x431   : > { %v2215_v17 = vpop.f32.mrb[3].mxu1  ;;  %v2221_v18 = vpop.f32.mrb[7].mxu0  ;;  %v1297_v19 = vadd.f32 %v1293_v10, %v459_v9  ;;  %v1298_v20 = vadd.f32 %v1294_v11, %v459_v9 }
 0x433   : > { %v1301_v21 = vsel %vm1108_vm4, %v1297_v19, -inf  ;;  %v1304_v22 = vsel %vm1108_vm4, %v1298_v20, -inf }
 0x434   : > { %1302 = vmax.xlane.f32.xlu1 %v1301_v21  ;;  %1305 = vmax.xlane.f32.xlu0 %v1304_v22 }
 0x436   : > { %v1241_v23 = vpop.f32.mrb[4].mxu1  ;;  %v1287_v24 = vpop.f32.mrb[8].mxu0 }
 0x437   : > { %v1295_v27 = vmul.f32 0.088388346, %v1241_v23  ;;  %v1296_v29 = vmul.f32 0.088388346, %v1287_v24  ;;  %v2226_v30 = vpop.f32.mrb[5].mxu1  ;;  %v2232_v32 = vpop.f32.mrb[9].mxu0 }
 0x438   : > { %v1244_v33 = vpop.f32.mrb[6].mxu1  ;;  %v1290_v35 = vpop.f32.mrb[10].mxu0 }
 0x439   : > { %v2227_v36 = vpop.f32.mrb[7].mxu1  ;;  %v2233_v37 = vpop.f32.mrb[11].mxu0  ;;  %v1299_v38 = vadd.f32 %v1295_v27, %v459_v9  ;;  %v1300_v63 = vadd.f32 %v1296_v29, %v459_v9 }
 0x43b   : > { %v1307_v39 = vsel %vm1108_vm4, %v1299_v38, -inf  ;;  %v1310_v1 = vsel %vm1108_vm4, %v1300_v63, -inf }
 0x43c   : > { %1308 = vmax.xlane.f32.xlu0 %v1307_v39  ;;  %1311 = vmax.xlane.f32.xlu1 %v1310_v1 }
 0x44d   : > { %836 = vrot.lane.b32.xlu1 %v2841_v26, %s3283_s19 }
 0x452   : > { %834 = vrot.lane.b32.xlu0 %v2833_v14, %s3283_s19 }
 0x4c1   : > { %v1303_v40 = vpop.xlane.xlu1 %1302  ;;  %v1306_v41 = vpop.xlane.xlu0 %1305 }
 0x4c2   : > { %v1313_v42 = vsub.f32 %v1297_v19, %v1303_v40  ;;  %v1314_v43 = vsub.f32 %v1298_v20, %v1306_v41 }
 0x4c4   : > { %v1317_v44 = vmul.f32 1.442695, %v1313_v42  ;;  %v1319_v45 = vmul.f32 1.442695, %v1314_v43 }
 0x4c6   : > { %2384 = vpow2.f32 %v1317_v44 }
 0x4c7   : > { %2386 = vpow2.f32 %v1319_v45 }
 0x4c9   : > { %v1312_v14 = vpop.xlane.xlu1 %1311  ;;  %v1309_v49 = vpop.xlane.xlu0 %1308 }
 0x4ca   : > { %v1316_v50 = vsub.f32 %v1300_v63, %v1312_v14  ;;  %v1315_v51 = vsub.f32 %v1299_v38, %v1309_v49 }
 0x4cc   : > { %v1323_v52 = vmul.f32 1.442695, %v1316_v50  ;;  %v1321_v53 = vmul.f32 1.442695, %v1315_v51 }
 0x4cd   : > { %v837_v57 = vpop.permute.xlu1 %836 }
 0x4ce   : > { %2388 = vpow2.f32 %v1323_v52 }
 0x4cf   : > { %2390 = vpow2.f32 %v1321_v53 }
 0x4d0   : > { %v3009_v46 = vpop.eup %2384 }
 0x4d1   : > { %v3011_v47 = vpop.eup %2386  ;;  %v1325_v48 = vsel %vm1108_vm4, %v3009_v46, 0.0 }
 0x4d2   : > { %1326 = vadd.xlane.f32.xlu0 %v1325_v48  ;;  %v1328_v26 = vsel %vm1108_vm4, %v3011_v47, 0.0 }
 0x4d3   : > { %1329 = vadd.xlane.f32.xlu1 %v1328_v26 }
 0x4d8   : > { %v3021_v54 = vpop.eup %2388 }
 0x4d9   : > { %v3023_v55 = vpop.eup %2390  ;;  %v1334_v56 = vsel %vm1108_vm4, %v3021_v54, 0.0 }
 0x4e4   : > { %838 = vrot.lane.b32.xlu1 %v2839_v25, %s3283_s19  ;;  %v1331_v25 = vsel %vm1108_vm4, %v3023_v55, 0.0 }
 0x4e8   : > { %840 = vrot.lane.b32.xlu0 %v2850_v31, %s3283_s19  ;;  %v835_v31 = vpop.permute.xlu0 %834 }
 0x507   : > { %1335 = vadd.xlane.f32.xlu0 %v1334_v56 }
 0x508   : > { %1332 = vadd.xlane.f32.xlu1 %v1331_v25 }
 0x55f   : > { %v1327_v58 = vpop.xlane.xlu0 %1326 }
 0x560   : > { %v1330_v59 = vpop.xlane.xlu1 %1329  ;;  %2392 = vrcp.f32 %v1327_v58 }
 0x561   : > { %2394 = vrcp.f32 %v1330_v59 }
 0x563   : > { %v841_v60 = vpop.permute.xlu0 %840 }
 0x564   : > { %v862_v61 = vcombine.low %v837_v57, %v841_v60  ;;  %v863_v62 = vcombine.high %v837_v57, %v841_v60  ;;  %v839_v2 = vpop.permute.xlu1 %838 }
 0x565   : > { %v846_v5 = vcombine.low %v835_v31, %v839_v2  ;;  %v847_v6 = vcombine.high %v835_v31, %v839_v2 }
 0x566   : > { %v870_v7 = vrot.slane %v862_v61, %v2844_v28  ;;  %v877_v3 = vrot.slane %v863_v62, %v2844_v28 }
 0x567   : > { %v854_v8 = vrot.slane %v846_v5, %v2844_v28  ;;  %v861_v9 = vrot.slane %v847_v6, %v2844_v28 }
 0x569   : > { %v878_v10 = vcombine.low %v854_v8, %v870_v7  ;;  %v879_v11 = vcombine.high %v854_v8, %v870_v7  ;;  %v894_v12 = vcombine.low %v861_v9, %v877_v3  ;;  %v895_v13 = vcombine.high %v861_v9, %v877_v3 }
 0x56a   : > { %v2393_v33 = vpop.eup %2392 }
 0x56b   : > { %v886_v15 = vrot.slane %v878_v10, %v2857_v34  ;;  %v893_v16 = vrot.slane %v879_v11, %v2857_v34  ;;  %v902_v17 = vrot.slane %v894_v12, %v2857_v34  ;;  %v909_v18 = vrot.slane %v895_v13, %v2857_v34  ;;  %v2395_v63 = vpop.eup %2394 }
 0x56c   : > { %v1341_v44 = vmul.f32 %v2393_v33, %v3009_v46  ;;  %v1342_v45 = vmul.f32 %v2395_v63, %v3011_v47  ;;  %v2374_v33 = vld [vmem:[#allocation2] sm:$0xff]  }
 0x56d   : > { %v914_v19 = vcombine.low %v886_v15, %v893_v16  ;;  %v2135_v20 = vcombine.high %v886_v15, %v893_v16  ;;  %v930_v21 = vcombine.low %v902_v17, %v909_v18  ;;  %v2136_v22 = vcombine.high %v902_v17, %v909_v18 }
 0x56e   : > { %v1345_v47 = vpack.c.bf16 %v1341_v44, %v1341_v44  ;;  %v1346_v51 = vpack.c.bf16 %v1342_v45, %v1342_v45 }
 0x56f   : > { %v921_v23 = vrot.slane %v914_v19, %v2844_v28  ;;  %v929_v24 = vrot.slane %v2135_v20, %v2844_v28  ;;  %v937_v27 = vrot.slane %v930_v21, %v2844_v28  ;;  %v945_v29 = vrot.slane %v2136_v22, %v2844_v28 }
 0x571   : > { %v946_v30 = vcombine.low %v921_v23, %v929_v24  ;;  %v947_v32 = vcombine.high %v921_v23, %v929_v24  ;;  %v962_v35 = vcombine.low %v937_v27, %v945_v29  ;;  %v963_v36 = vcombine.high %v937_v27, %v945_v29 }
 0x573   : > { %v954_v37 = vrot.slane %v946_v30, %v2857_v34  ;;  %v961_v38 = vrot.slane %v947_v32, %v2857_v34  ;;  %v970_v39 = vrot.slane %v962_v35, %v2857_v34  ;;  %v977_v1 = vrot.slane %v963_v36, %v2857_v34 }
 0x575   : > { %v978_v40 = vcombine.low %v954_v37, %v970_v39  ;;  %v979_v41 = vcombine.high %v954_v37, %v970_v39  ;;  %v980_v42 = vcombine.low %v961_v38, %v977_v1  ;;  %v981_v43 = vcombine.high %v961_v38, %v977_v1 }
 0x577   : > { %v982_v48 = vpack.c.bf16 %v978_v40, %v978_v40  ;;  %v983_v26 = vpack.c.bf16 %v979_v41, %v979_v41  ;;  %v984_v14 = vpack.c.bf16 %v980_v42, %v980_v42  ;;  %v985_v49 = vpack.c.bf16 %v981_v43, %v981_v43  ;;  %v2375_v41 = vld [vmem:[#allocation2 + $0x8] sm:$0xff]  }
 0x579   : > { %1104 = vst.msk [vmem:[%s3049_s17] sm:$0xf] %vm1099_vm3, %v982_v48  ;;  %v1354_v50 = vsel %vm1352_vm5, %v982_v48, 0  ;;  %1105 = vst.msk [vmem:[%s3049_s17 + $0x4] sm:$0xf] %vm1099_vm3, %v983_v26  ;;  %v1400_v46 = vsel %vm1352_vm5, %v983_v26, 0 }
 0x57a   : > { %1106 = vst.msk [vmem:[%s3049_s17 + $0x8] sm:$0xf] %vm1099_vm3, %v984_v14  ;;  %1107 = vst.msk [vmem:[%s3049_s17 + $0xc] sm:$0xf] %vm1099_vm3, %v985_v49  ;;  %2235 = vmatpush3.bf16.msra.mxu1 %v1354_v50  ;;  %2241 = vmatpush3.bf16.msra.mxu0 %v1400_v46  ;;  %v1446_v52 = vsel %vm1352_vm5, %v984_v14, 0  ;;  %v1492_v53 = vsel %vm1352_vm5, %v985_v49, 0 }
 0x57b   : > { %2246 = vmatprep.subr.bf16.mxu1 %v2598_v4  ;;  %2252 = vmatprep.subr.bf16.mxu0 %v2598_v4 }
 0x57d   : > { %2237 = vmatmul.mubr.msk.bf16.vlgmr.msra.gmra.mrb[8].mxu1 %vm1108_vm4, %v1345_v47  ;;  %2243 = vmatmul.mubr.msk.bf16.vlgmr.msra.gmra.mrb[12].mxu0 %vm1108_vm4, %v1346_v51 }
 0x57e   : > { %2247 = vmatpush3.bf16.msra.mxu1 %v1446_v52  ;;  %2253 = vmatpush3.bf16.msra.mxu0 %v1492_v53 }
 0x57f   : > { %2248 = vmatprep.mubr.msk.bf16.mxu1 %vm2599_vm1, %v2598_v4  ;;  %2254 = vmatprep.mubr.msk.bf16.mxu0 %vm2599_vm1, %v2598_v4 }
 0x580   : > { %2258 = vmatprep.subr.bf16.mxu1 %v2598_v4  ;;  %2266 = vmatprep.subr.bf16.mxu0 %v2598_v4 }
 0x594   : > { %v1336_v56 = vpop.xlane.xlu0 %1335 }
 0x595   : > { %2396 = vrcp.f32 %v1336_v56  ;;  %v1333_v25 = vpop.xlane.xlu1 %1332 }
 0x596   : > { %2398 = vrcp.f32 %v1333_v25 }
 0x59f   : > { %v2397_v31 = vpop.eup %2396 }
 0x5a0   : > { %v2399_v57 = vpop.eup %2398  ;;  %v1344_v58 = vmul.f32 %v2397_v31, %v3021_v54 }
 0x5a1   : > { %v1343_v59 = vmul.f32 %v2399_v57, %v3023_v55 }
 0x5a2   : > { %v1348_v60 = vpack.c.bf16 %v1344_v58, %v1344_v58 }
 0x5a3   : > { %v1347_v61 = vpack.c.bf16 %v1343_v59, %v1343_v59 }
 0x5a4   : > { %2255 = vmatmul.mubr.msk.bf16.vlgmr.msra.gmra.mrb[16].mxu0 %vm1108_vm4, %v1348_v60 }
 0x5a5   : > { %2249 = vmatmul.mubr.msk.bf16.vlgmr.msra.gmra.mrb[12].mxu1 %vm1108_vm4, %v1347_v61  ;;  %2270 = vmatprep.mubr.msk.bf16.mxu0 %vm2599_vm1, %v2598_v4 }
 0x5a6   : > { %2262 = vmatprep.mubr.msk.bf16.mxu1 %vm2599_vm1, %v2598_v4  ;;  %2259 = vmatpush3.bf16.msra.mxu1 %v2374_v33 }
 0x5a7   : > { %2260 = vmatprep.subr.bf16.mxu1 %v2598_v4 }
 0x5aa   : > { %2261 = vmatpush3.bf16.msra.mxu1 %v2375_v41 }
 0x5ab   : > { %2274 = vmatprep.subr.bf16.mxu1 %v2598_v4 }
 0x650   : > { %v1390_v62 = vpop.f32.mrb[8].mxu1  ;;  %v1436_v2 = vpop.f32.mrb[12].mxu0 }
 0x651   : > { %v2238_v5 = vpop.f32.mrb[9].mxu1  ;;  %v2244_v6 = vpop.f32.mrb[13].mxu0 }
 0x652   : > { %v1393_v7 = vpop.f32.mrb[10].mxu1  ;;  %v1439_v54 = vpop.f32.mrb[14].mxu0 }
 0x653   : > { %v2239_v3 = vpop.f32.mrb[11].mxu1  ;;  %v2245_v55 = vpop.f32.mrb[15].mxu0 }
 0x654   : > { %v2376_v55 = vld [vmem:[#allocation5] sm:$0xff]  }
 0x655   : > { %2267 = vmatpush3.bf16.msra.mxu0 %v2376_v55 }
 0x656   : > { %2268 = vmatprep.subr.bf16.mxu0 %v2598_v4 }
 0x677   : > { %v1528_v8 = vpop.f32.mrb[16].mxu0 }
 0x678   : > { %v1482_v9 = vpop.f32.mrb[12].mxu1  ;;  %v1550_v10 = vcombine.low %v1436_v2, %v1528_v8  ;;  %v1551_v11 = vcombine.high %v1436_v2, %v1528_v8  ;;  %v2256_v12 = vpop.f32.mrb[17].mxu0  ;;  %v2377_v8 = vld [vmem:[#allocation5 + $0x8] sm:$0xff]  }
 0x679   : > { %v1534_v13 = vcombine.low %v1390_v62, %v1482_v9  ;;  %v1535_v15 = vcombine.high %v1390_v62, %v1482_v9  ;;  %v2250_v16 = vpop.f32.mrb[13].mxu1  ;;  %v1531_v17 = vpop.f32.mrb[18].mxu0  ;;  %2269 = vmatpush3.bf16.msra.mxu0 %v2377_v8 }
 0x67a   : > { %v1558_v18 = vrot.slane %v1550_v10, %v2844_v28  ;;  %v1565_v19 = vrot.slane %v1551_v11, %v2844_v28  ;;  %v1485_v20 = vpop.f32.mrb[14].mxu1  ;;  %v2257_v21 = vpop.f32.mrb[19].mxu0  ;;  %v2378_v17 = vld [vmem:[%s3268_s9] sm:$0xff]  }
 0x67b   : > { %v1542_v22 = vrot.slane %v1534_v13, %v2844_v28  ;;  %v1549_v23 = vrot.slane %v1535_v15, %v2844_v28  ;;  %v2251_v24 = vpop.f32.mrb[15].mxu1  ;;  %v2381_v20 = vld [vmem:[%s3268_s9 + $0x18] sm:$0xff]  }
 0x67d   : > { %v1566_v27 = vcombine.low %v1542_v22, %v1558_v18  ;;  %v1567_v29 = vcombine.high %v1542_v22, %v1558_v18  ;;  %v1582_v30 = vcombine.low %v1549_v23, %v1565_v19  ;;  %v1583_v32 = vcombine.high %v1549_v23, %v1565_v19  ;;  %v2379_v18 = vld [vmem:[%s3268_s9 + $0x8] sm:$0xff]   ;;  %v2380_v19 = vld [vmem:[%s3268_s9 + $0x10] sm:$0xff]  }
 0x67f   : > { %v1574_v35 = vrot.slane %v1566_v27, %v2857_v34  ;;  %v1581_v36 = vrot.slane %v1567_v29, %v2857_v34  ;;  %v1590_v37 = vrot.slane %v1582_v30, %v2857_v34  ;;  %v1597_v38 = vrot.slane %v1583_v32, %v2857_v34 }
 0x681   : > { %v1602_v63 = vcombine.low %v1574_v35, %v1581_v36  ;;  %v2145_v39 = vcombine.high %v1574_v35, %v1581_v36  ;;  %v1618_v1 = vcombine.low %v1590_v37, %v1597_v38  ;;  %v2146_v40 = vcombine.high %v1590_v37, %v1597_v38 }
 0x683   : > { %v1609_v42 = vrot.slane %v1602_v63, %v2844_v28  ;;  %v1617_v43 = vrot.slane %v2145_v39, %v2844_v28  ;;  %v1625_v44 = vrot.slane %v1618_v1, %v2844_v28  ;;  %v1633_v45 = vrot.slane %v2146_v40, %v2844_v28 }
 0x685   : > { %v1635_v48 = vcombine.high %v1609_v42, %v1617_v43  ;;  %v1651_v26 = vcombine.high %v1625_v44, %v1633_v45  ;;  %v1634_v14 = vcombine.low %v1609_v42, %v1617_v43  ;;  %v1650_v49 = vcombine.low %v1625_v44, %v1633_v45 }
 0x687   : > { %v1649_v50 = vrot.slane %v1635_v48, %v2857_v34  ;;  %v1665_v46 = vrot.slane %v1651_v26, %v2857_v34  ;;  %v1642_v47 = vrot.slane %v1634_v14, %v2857_v34  ;;  %v1658_v51 = vrot.slane %v1650_v49, %v2857_v34 }
 0x689   : > { %v1668_v52 = vcombine.low %v1649_v50, %v1665_v46  ;;  %v1667_v53 = vcombine.high %v1642_v47, %v1658_v51  ;;  %v1669_v56 = vcombine.high %v1649_v50, %v1665_v46  ;;  %v1666_v25 = vcombine.low %v1642_v47, %v1658_v51 }
 0x68b   : > { %1675 = vrot.lane.b32.xlu1 %v1668_v52, %s2609_s21  ;;  %1671 = vrot.lane.b32.xlu0 %v1667_v53, %s2610_s24  ;;  %s3144_s21 = scalar_lea.sflag [#allocation9], %s1922_s15  ;;  %s2462_s24 = scalar_lea.vmem %s3142_s16, 256 }
 0x68c   : > { %p2463_p12 = scmp.ne.s32.totalorder %s3142_s16, %s2462_s24 }
 0x68e   : > { %p2464_p2 = pnand %p2463_p12, %p3301_p1 }
 0x68f   : > { %1679 = vrot.lane.b32.xlu1 %v1669_v56, %s2611_s18  ;;  %s2612_s18 = smov [#allocation8]  }
 0x690   : > { %p2465_p3 = pneg %p2464_p2 }
 0x6fd   : > { %v1676_v28 = vpop.permute.xlu1 %1675  ;;  %v1672_v31 = vpop.permute.xlu0 %1671 }
 0x6fe   : > { %v1682_v57 = vsel %vm1108_vm4, %v1666_v25, %v1672_v31 }
 0x6ff   : > { %v1684_v59 = vsel %vm1683_vm6, %v1682_v57, %v1676_v28 }
 0x701   : > { %v1680_v58 = vpop.permute.xlu1 %1679 }
 0x702   : > { %v1686_v60 = vsel %vm1685_vm7, %v1684_v59, %v1680_v58 }
 0x703   : > { %v1687_v34 = vpack.c.bf16 %v1686_v60, %v1686_v60 }
 0x705   : > { %2263 = vmatmul.mubr.msk.bf16.vlgmr.msra.gmra.mrb[16].mxu1 %vm464_vm0, %v1687_v34 }
 0x706   : > { %2282 = vmatprep.mubr.msk.bf16.mxu1 %vm2599_vm1, %v2598_v4  ;;  %2275 = vmatpush3.bf16.msra.mxu1 %v2378_v17 }
 0x707   : > { %2276 = vmatprep.subr.bf16.mxu1 %v2598_v4 }
 0x70a   : > { %2277 = vmatpush3.bf16.msra.mxu1 %v2379_v18 }
 0x70b   : > { %2278 = vmatprep.subr.bf16.mxu1 %v2598_v4 }
 0x70e   : > { %2279 = vmatpush3.bf16.msra.mxu1 %v2380_v19 }
 0x70f   : > { %2280 = vmatprep.subr.bf16.mxu1 %v2598_v4 }
 0x712   : > { %2281 = vmatpush3.bf16.msra.mxu1 %v2381_v20 }
 0x7d8   : > { %v1741_v61 = vpop.f32.mrb[16].mxu1 }
 0x7d9   : > { %v1747_v62 = vmul.f32 0.22, %v1741_v61  ;;  %v2264_v2 = vpop.f32.mrb[17].mxu1 }
 0x7da   : > { %v1744_v5 = vpop.f32.mrb[18].mxu1 }
 0x7db   : > { %v3104_v6 = vadd.f32 %v1747_v62, %v2807_v0  ;;  %v2265_v7 = vpop.f32.mrb[19].mxu1  ;;  %v2150_v0 = vld [vmem:[%s3266_s7] ss:$0 sm:$0xff] }
 0x7dd   : > { %v1750_v54 = vmul.f32 %v3104_v6, %v3104_v6 }
 0x7df   : > { %v1751_v3 = vsel %vm464_vm0, %v1750_v54, 0.0 }
 0x7e0   : > { %1752 = vadd.xlane.f32.xlu0 %v1751_v3 }
 0x86d   : > { %v1753_v9 = vpop.xlane.xlu0 %1752 }
 0x86e   : > { %v1754_v10 = vmul.f32 0.03125, %v1753_v9 }
 0x870   : > { %v1755_v11 = vadd.f32 1e-06, %v1754_v10 }
 0x872   : > { %2400 = vrsqrt.f32 %v1755_v11 }
 0x87c   : > { %v2401_v12 = vpop.eup %2400 }
 0x87d   : > { %v1757_v13 = vmul.f32 %v2401_v12, %v3104_v6 }
 0x87f   : > { %v1764_v15 = vmul.f32 %v2150_v0, %v1757_v13 }
 0x881   : > { %v1765_v16 = vpack.c.bf16 %v1764_v15, %v1764_v15 }
 0x883   : > { %2271 = vmatmul.mubr.msk.bf16.vlgmr.msra.gmra.mrb[20].mxu0 %vm464_vm0, %v1765_v16 }
 0x956   : > { %v1819_v21 = vpop.f32.mrb[20].mxu0 }
 0x957   : > { %1833 = vrot.lane.b32.xlu1 %v1819_v21, %s3283_s19  ;;  %v2272_v22 = vpop.f32.mrb[21].mxu0  ;;  %v2154_v27 = vmul.f32 -1.442695, %v1819_v21  ;;  %s2466_s19 = sshll.u32 %s2612_s18, 4  ;;  %s2467_s19 = int_to_ptr.vmem [resolvable:$false] %s2466_s19 }
 0x958   : > { %v1822_v23 = vpop.f32.mrb[22].mxu0  ;;  %s2468_s28 = scalar_lea.vmem %s2467_s19, 512  ;;  %p2469_p4 = scmp.lt.s32.totalorder %s3142_s16, %s2467_s19 }
 0x959   : > { %v2273_v24 = vpop.f32.mrb[23].mxu0  ;;  %2402 = vpow2.f32 %v2154_v27  ;;  %p2470_p7 = scmp.lt.s32.totalorder %s2468_s28, %s2462_s24 }
 0x95b   : > { %p2471_p8 = por %p2470_p7, %p2469_p4 }
 0x95d   : > { %p2472_p11 = pnand %p2471_p8, %p2465_p3 }
 0x963   : > { %v2403_v29 = vpop.eup %2402 }
 0x964   : > { %v1828_v4 = vadd.f32 1.0, %v2403_v29 }
 0x966   : > { %2404 = vrcp.f32 %v1828_v4 }
 0x970   : > { %v2405_v30 = vpop.eup %2404 }
 0x971   : > { %v1831_v32 = vmul.f32 %v2405_v30, %v1819_v21 }
 0x9c9   : > { %v1834_v33 = vpop.permute.xlu1 %1833 }
 0x9ca   : > { %v1836_v35 = vmul.f32 %v1834_v33, %v1831_v32 }
 0x9cc   : > { %v1837_v36 = vpack.c.bf16 %v1836_v35, %v1836_v35 }
 0x9ce   : > { %2283 = vmatmul.mubr.msk.bf16.vlgmr.msra.gmra.mrb[20].mxu1 %vm1870_vm8, %v1837_v36 }
 0x9cf   : > { %2475 = shalt.err (!%p2472_p11)
}
 0x9d0   : > { %s2476_s27 = scalar_lea.hbm %s3138_s26, 256  ;;  %s2480_s18 = scalar_lea.hbm %s3270_s11, 512 }
 0x9d1   : > { %p2477_p13 = scmp.ne.s32.totalorder %s3138_s26, %s2476_s27  ;;  %p2481_p6 = scmp.lt.u32.totalorder %s3138_s26, %s3270_s11 }
 0x9d2   : > { %p2482_p9 = scmp.lt.u32.totalorder %s2480_s18, %s2476_s27  ;;  %p2484_p12 = scmp.lt.u32.totalorder %s2476_s27, %s3138_s26 }
 0x9d3   : > { %p2478_p5 = pnand %p2477_p13, %p3301_p1 }
 0x9d4   : > { %p2483_p10 = por %p2482_p9, %p2481_p6 }
 0x9d5   : > { %p2479_p0 = pneg %p2478_p5 }
 0x9d6   : > { %p2485_p2 = por %p2484_p12, %p2483_p10 }
 0x9d8   : > { %p2486_p3 = pnand %p2485_p2, %p2479_p0 }
 0x9da   : > { %2489 = shalt.err (!%p2486_p3)
}
 0x9db   : > { %s3302_s24 = smov 64   ;;  %s3303_s30 = sshll.u32 %s2701_s25, 8 }
 0x9dc   : > { %2295 = dma.vmem_to_hbm [thread:$0]  (%p3301_p1), %s3142_s16, 256, %s3138_s26, %s3144_s21, %s3302_s24, %s3302_s24, %s2606_s14  }
 0x9dd   : > { %s3180_s15 = scalar_lea.hbm %s3271_s12, %s3303_s30  ;;  %s2490_s23 = scalar_lea.vmem %s3173_s29, 256 }
 0x9de   : > { %p2491_p4 = scmp.ne.s32.totalorder %s3173_s29, %s2490_s23  ;;  %s2613_s18 = smov [#allocation10]  }
 0x9df   : > { %s2494_s19 = sshll.u32 %s2613_s18, 4  ;;  %s2495_s19 = int_to_ptr.vmem [resolvable:$false] %s2494_s19 }
 0x9e0   : > { %p2492_p7 = pnand %p2491_p4, %p3301_p1  ;;  %s2496_s17 = scalar_lea.vmem %s2495_s19, 512 }
 0x9e1   : > { %p2497_p11 = scmp.lt.s32.totalorder %s3173_s29, %s2495_s19  ;;  %p2498_p13 = scmp.lt.s32.totalorder %s2496_s17, %s2490_s23 }
 0x9e2   : > { %p2493_p8 = pneg %p2492_p7 }
 0x9e3   : > { %p2499_p5 = por %p2498_p13, %p2497_p11 }
 0x9e5   : > { %p2500_p0 = pnand %p2499_p5, %p2493_p8 }
 0x9e7   : > { %2503 = shalt.err (!%p2500_p0)
}
 0x9e8   : > { %s2504_s26 = scalar_lea.hbm %s3180_s15, 256  ;;  %s2508_s28 = scalar_lea.hbm %s3271_s12, 512 }
 0x9e9   : > { %p2505_p6 = scmp.ne.s32.totalorder %s3180_s15, %s2504_s26  ;;  %p2509_p12 = scmp.lt.u32.totalorder %s3180_s15, %s3271_s12 }
 0x9ea   : > { %p2510_p2 = scmp.lt.u32.totalorder %s2508_s28, %s2504_s26  ;;  %p2512_p4 = scmp.lt.u32.totalorder %s2504_s26, %s3180_s15 }
 0x9eb   : > { %p2506_p9 = pnand %p2505_p6, %p3301_p1 }
 0x9ec   : > { %p2511_p3 = por %p2510_p2, %p2509_p12 }
 0x9ed   : > { %p2507_p10 = pneg %p2506_p9 }
 0x9ee   : > { %p2513_p7 = por %p2512_p4, %p2511_p3 }
 0x9f0   : > { %p2514_p8 = pnand %p2513_p7, %p2507_p10 }
 0x9f2   : > { %2517 = shalt.err (!%p2514_p8)
}
 0x9f3   : > { %2296 = dma.vmem_to_hbm [thread:$0]  (%p3301_p1), %s3173_s29, 256, %s3180_s15, %s3144_s21, %s3302_s24, %s3302_s24, %s2606_s14  }
 0x9f4   : > { %s2123_s23 = sshll.u32 %s2925_s20, 3  ;;  %s2163_s19 = sshll.u32 %s2701_s25, 7 }
 0x9f5   : > { %s438_s17 = scalar_lea.vmem [#allocation7], %s2123_s23  ;;  %s3213_s28 = scalar_lea.hbm %s3269_s10, %s2163_s19 }
 0x9f6   : > { %s1941_s26 = sshll.u32 %s438_s17, 4  ;;  %s1918_s25 = scalar_lea.sflag [#allocation4], %s2925_s20  ;;  %s3215_s26 = int_to_ptr.vmem [resolvable:$true] %s1941_s26 }
 0x9f7   : > { %s2518_s14 = scalar_lea.vmem %s3215_s26, 128  ;;  %s2614_s29 = smov [#allocation7]  }
 0x9f8   : > { %p2519_p11 = scmp.ne.s32.totalorder %s3215_s26, %s2518_s14  ;;  %s2522_s21 = sshll.u32 %s2614_s29, 4  ;;  %s2523_s21 = int_to_ptr.vmem [resolvable:$false] %s2522_s21 }
 0x9f9   : > { %s2524_s24 = scalar_lea.vmem %s2523_s21, 256  ;;  %p2525_p0 = scmp.lt.s32.totalorder %s3215_s26, %s2523_s21 }
 0x9fa   : > { %p2520_p13 = pnand %p2519_p11, %p3301_p1  ;;  %p2526_p6 = scmp.lt.s32.totalorder %s2524_s24, %s2518_s14 }
 0x9fc   : > { %p2521_p5 = pneg %p2520_p13  ;;  %p2527_p9 = por %p2526_p6, %p2525_p0 }
 0x9fe   : > { %p2528_p10 = pnand %p2527_p9, %p2521_p5 }
 0xaa1   : > { %v1908_v37 = vpop.f32.mrb[20].mxu1 }
 0xaa2   : > { %v1914_v38 = vmul.f32 0.22, %v1908_v37  ;;  %v2284_v63 = vpop.f32.mrb[21].mxu1 }
 0xaa3   : > { %v1911_v39 = vpop.f32.mrb[22].mxu1 }
 0xaa4   : > { %v1915_v1 = vadd.f32 %v1914_v38, %v3104_v6  ;;  %v2285_v40 = vpop.f32.mrb[23].mxu1 }
 0xaa6   : > { %1916 = vst.msk [vmem:[%s438_s17] sm:$0xff] %vm464_vm0, %v1915_v1 }
 0xaa7   : > { %2531 = shalt.err (!%p2528_p10)
}
 0xaa8   : > { %s2532_s20 = scalar_lea.hbm %s3213_s28, 128  ;;  %s2536_s18 = scalar_lea.hbm %s3269_s10, 256 }
 0xaa9   : > { %p2533_p12 = scmp.ne.s32.totalorder %s3213_s28, %s2532_s20  ;;  %p2537_p4 = scmp.lt.u32.totalorder %s3213_s28, %s3269_s10 }
 0xaaa   : > { %p2538_p7 = scmp.lt.u32.totalorder %s2536_s18, %s2532_s20  ;;  %p2540_p11 = scmp.lt.u32.totalorder %s2532_s20, %s3213_s28 }
 0xaab   : > { %p2534_p2 = pnand %p2533_p12, %p3301_p1 }
 0xaac   : > { %p2539_p8 = por %p2538_p7, %p2537_p4 }
 0xaad   : > { %p2535_p3 = pneg %p2534_p2 }
 0xaae   : > { %p2541_p13 = por %p2540_p11, %p2539_p8 }
 0xab0   : > { %p2542_p5 = pnand %p2541_p13, %p2535_p3 }
 0xab2   : > { %2545 = shalt.err (!%p2542_p5)
}
 0xab3   : > { %2294 = dma.vmem_to_hbm [thread:$0]  (%p3301_p1), %s3215_s26, 128, %s3213_s28, %s1918_s25  }
 0xab4 PF: > { %s3304_s17 = sld [smem:[#allocation17_spill]]  ;;  %s3305_s16 = sld [smem:[#allocation15_spill]] }
 0xab5   : > { %s3306_s30 = sld [smem:[#allocation20_spill]] }
 0xaba   : > { %p2321_p0 = scmp.ge.s32.totalorder %s3304_s17, 2  ;;  %s1985_s14 = sand.u32 1, %s3305_s16  }
 0xabb   : > { %p3307_p6 = scmp.ne.s32.totalorder %s3306_s30, 0  ;;  %s1986_s29 = scalar_lea.sflag [#allocation4], %s1985_s14 }
 0xabd   : > { %p2308_p9 = pnand %p2321_p0, %p3307_p6 }
 0xabf   : > { %2571 = dma.done.wait (!%p2308_p9), %s1986_s29, 128  }
 0xac0   : > { %2573 = vsyncadd (!%p2308_p9), %s1986_s29, 4294967168  ;;  %s3308_s21 = sadd.s32 4294967294, %s3304_s17  }
 0xac1   : > { %s1994_s24 = sand.u32 1, %s3308_s21  }
 0xac2   : > { %s1995_s20 = scalar_lea.sflag [#allocation9], %s1994_s24 }
 0xac3   : > { %2575 = dma.done.wait (!%p2308_p9), %s1995_s20, 512  }
 0xac4   : > { %2577 = vsyncadd (!%p2308_p9), %s1995_s20, 4294966784  ;;  %s3309_s24 = sld [smem:[#allocation18_spill]]  ;;  %s3310_s13 = sld [smem:[#allocation16_spill]] }
 0xac5   : > { %s3311_s23 = sld [smem:[#allocation19_spill]]  ;;  %s3312_s21 = smov %s2584_s22 }
 0xaca   : > { %p28_p1 = scmp.ge.s32.totalorder %s3309_s24, 4   ;;  %s3313_s22 = smov %s3310_s13 }
 0xacc   :  { %30 = sbr.rel (!%p28_p1) target bundleno = 7 (0x7), region = 136 }
 0xad3   :  { %2009 = vsyncpa [#allocation3], 1 }
 0xad4   :  { %2011 = vsyncpa [#allocation3 + $0x1], 1 }
 0xad5   :  { %2012 = vsyncpa [#allocation6], 1 }
 0xad6   :  { %2013 = vsyncpa [#allocation4], 1 }
 0xad7   :  { %2015 = vsyncpa [#allocation4 + $0x1], 1 }
 0xad8   :  { %2016 = vsyncpa [#allocation9], 1 }
 0xad9   :  { %2018 = vsyncpa [#allocation9 + $0x1], 1 }

</bundles_post_ra>
